<compile_context>
chip_gen: v7x
topology: tpu7x:2x2x1
jax: 0.10.0
libtpu: 0.0.40
codegen_flags: <defaults>
</compile_context>

<pallas_src>
import numpy as np
import jax
import jax.numpy as jnp
from jax.experimental import pallas as pl
from jax.experimental.pallas import tpu as pltpu

# ---------------- model config (small shapes) ----------------
N, CIN, H, W = 2, 4, 16, 16
COUT = 8
KH = KW = 3
NUM_CLASSES = 10
FLAT = COUT * H * W
HP, WP = H + 2, W + 2          # zero-padded spatial dims (padding=1)
XCOL = CIN * WP                # 72  : fused (c, u) column index of a padded row
OCOL = W * COUT                # 128 : fused (w, o) column index of conv output


# ---------------- 4-bit fake quantization (matches QuantizedModel) ----------
def quantize_tensor(t):
    """Quantizes a tensor to 4-bit integers (same math as the torch module)."""
    min_val = t.min()
    max_val = t.max()
    scale = (max_val - min_val) / 15.0
    # Guard only the degenerate constant-tensor case (torch would produce NaN).
    scale = jnp.where(scale == 0, jnp.float32(1.0), scale)
    q = jnp.clip(jnp.round((t - min_val) / scale), 0.0, 15.0) - 8.0
    return q.astype(jnp.int8), scale, min_val


def dequantize_tensor(q, scale, min_val):
    # Matches torch: q*scale + min (the -8 offset is NOT compensated).
    return q.astype(jnp.float32) * scale + min_val


def fake_quant(t):
    q, s, m = quantize_tensor(t)
    return dequantize_tensor(q, s, m)


# ---------------- host-side weight preparation (one-time) -------------------
def prep_params(conv_w_oihw, conv_b, lin_w_oi, lin_b):
    """Convert (already fake-quantized) PyTorch-layout weights into kernel form.

    Returns:
      m      (KH, XCOL, OCOL): banded conv matrix; m[kh, c*WP+u, w*COUT+o]
                               = conv_w[o, c, kh, u-w] if 0 <= u-w < KW else 0.
      cb_row (1, OCOL)       : conv bias replicated over the fused (w,o) lanes.
      lw3    (H, OCOL, 10)   : linear weight permuted so the kernel's
                               (h, w*COUT+o) layout matches PyTorch's NCHW
                               flatten order (c*H*W + h*W + w).
      lb_row (1, 10)         : linear bias.
    """
    wq = np.asarray(conv_w_oihw, dtype=np.float32)          # (COUT, CIN, KH, KW)
    m = np.zeros((KH, XCOL, OCOL), np.float32)
    rows_c = np.arange(CIN) * WP
    cols_o = np.arange(COUT)
    for kh in range(KH):
        for kw in range(KW):
            blk = wq[:, :, kh, kw].T                          # (CIN, COUT)
            for w in range(W):
                u = w + kw
                m[kh, (rows_c + u)[:, None], (w * COUT + cols_o)[None, :]] = blk

    cb_row = np.tile(np.asarray(conv_b, np.float32), W).reshape(1, OCOL)

    lw4 = np.asarray(lin_w_oi, np.float32).reshape(NUM_CLASSES, COUT, H, W)
    lw3 = np.transpose(lw4, (2, 3, 1, 0)).reshape(H, OCOL, NUM_CLASSES)

    lb_row = np.asarray(lin_b, np.float32).reshape(1, NUM_CLASSES)
    return (jnp.asarray(m), jnp.asarray(cb_row),
            jnp.asarray(lw3), jnp.asarray(lb_row))


# ---------------- fused Pallas kernel ----------------------------------------
def fused_forward_kernel(x_ref, m_ref, cb_ref, lw_ref, lb_ref, o_ref):
    # x_ref : (N, HP, XCOL)          padded input, rows = (c,u) fused on lanes
    # m_ref : (KH, XCOL, OCOL)       banded conv weight
    # cb_ref: (1, OCOL)              conv bias (replicated)
    # lw_ref: (H, OCOL, NUM_CLASSES) permuted linear weight
    # lb_ref: (1, NUM_CLASSES)       linear bias
    # o_ref : (N, NUM_CLASSES)       logits
    cb = cb_ref[...]
    lb = lb_ref[...]
    outs = []
    for n in range(N):                                   # N = 2, static unroll
        x2 = x_ref[n]                                    # (HP, XCOL) = (18, 72)
        acc = jnp.zeros((H, OCOL), jnp.float32)
        for kh in range(KH):                             # 3 MXU dots
            acc = acc + jnp.dot(x2[kh:kh + H, :], m_ref[kh],
                                preferred_element_type=jnp.float32)
        conv2 = jnp.maximum(acc + cb, 0.0)               # (16, 128) lane-dense
        out_n = lb                                       # (1, NUM_CLASSES)
        for h in range(H):                               # 16 small MXU dots
            out_n = out_n + jnp.dot(conv2[h:h + 1, :], lw_ref[h],
                                    preferred_element_type=jnp.float32)
        outs.append(out_n)
    o_ref[...] = jnp.concatenate(outs, axis=0)


def fused_forward(x_rows, m, cb, lw3, lb):
    return pl.pallas_call(
        fused_forward_kernel,
        out_shape=jax.ShapeDtypeStruct((N, NUM_CLASSES), jnp.float32),
        grid=(1,),
        in_specs=[
            pl.BlockSpec((N, HP, XCOL), lambda i: (0, 0, 0)),
            pl.BlockSpec((KH, XCOL, OCOL), lambda i: (0, 0, 0)),
            pl.BlockSpec((1, OCOL), lambda i: (0, 0)),
            pl.BlockSpec((H, OCOL, NUM_CLASSES), lambda i: (0, 0, 0)),
            pl.BlockSpec((1, NUM_CLASSES), lambda i: (0, 0)),
        ],
        out_specs=pl.BlockSpec((N, NUM_CLASSES), lambda i: (0, 0)),
        compiler_params=pltpu.CompilerParams(
            dimension_semantics=("arbitrary",)),
    )(x_rows, m, cb, lw3, lb)


@jax.jit
def quantized_model_forward(x_nchw, params):
    """Equivalent of QuantizedModel.forward(x) = self.model(x)."""
    m, cb, lw3, lb = params
    # Zero-pad spatially (padding=1) and fuse (C, W) onto the lane dimension:
    # x_rows[n, r, c*WP + u] = x_pad[n, c, r, u].  (No minor-dim transpose.)
    x_pad = jnp.pad(x_nchw, ((0, 0), (0, 0), (1, 1), (1, 1)))
    x_rows = jnp.transpose(x_pad, (0, 2, 1, 3)).reshape(N, HP, XCOL)
    return fused_forward(x_rows, m, cb, lw3, lb)


if __name__ == "__main__":
    key = jax.random.PRNGKey(0)
    k1, k2, k3, k4, k5 = jax.random.split(key, 5)

    # Deterministic parameter init in PyTorch layouts.
    conv_w_oihw = jax.random.normal(k1, (COUT, CIN, KH, KW), jnp.float32) * 0.1
    conv_b = jax.random.normal(k2, (COUT,), jnp.float32) * 0.1
    lin_w_oi = jax.random.normal(k3, (NUM_CLASSES, FLAT), jnp.float32) * 0.05
    lin_b = jax.random.normal(k4, (NUM_CLASSES,), jnp.float32) * 0.05

    # QuantizedModel.quantize_model(): fake-quantize every "weight" param
    # (biases untouched); the model then runs with the dequantized weights.
    conv_w_dq = fake_quant(conv_w_oihw)
    lin_w_dq = fake_quant(lin_w_oi)
    # TODO(synk): save/load_quantized_weights are file I/O (torch.save/load); not translated.

    params = prep_params(conv_w_dq, conv_b, lin_w_dq, lin_b)

    x = jax.random.normal(k5, (N, CIN, H, W), jnp.float32)

    out = quantized_model_forward(x, params)
    out = jax.block_until_ready(out)
    assert out.shape == (N, NUM_CLASSES)

    # Plain-JAX reference for sanity (same dequantized weights).
    ref_conv = jax.lax.conv_general_dilated(
        x, conv_w_dq, (1, 1), "SAME",
        dimension_numbers=("NCHW", "OIHW", "NCHW"),
    ) + conv_b.reshape(1, COUT, 1, 1)
    ref = jnp.maximum(ref_conv, 0.0).reshape(N, FLAT) @ lin_w_dq.T + lin_b
    assert jnp.allclose(out, ref, rtol=1e-2, atol=1e-2), "mismatch vs reference"

    print("KERNEL_OK")
</pallas_src>

<mosaic_0001>
module attributes {stable_mosaic.version = 11 : i64} {
  func.func @fused_forward_kernel(%arg0: i32, %arg1: memref<2x18x72xf32, #tpu.memory_space<vmem>>, %arg2: memref<3x72x128xf32, #tpu.memory_space<vmem>>, %arg3: memref<1x128xf32, #tpu.memory_space<vmem>>, %arg4: memref<16x128x10xf32, #tpu.memory_space<vmem>>, %arg5: memref<1x10xf32, #tpu.memory_space<vmem>>, %arg6: memref<2x10xf32, #tpu.memory_space<vmem>>) attributes {dimension_semantics = [#tpu.dimension_semantics<arbitrary>], iteration_bounds = array<i64: 1>, scalar_prefetch = 0 : i64, scratch_operands = 0 : i64, tpu.core_type = #tpu.core_type<tc>, window_params = [{pipeline_mode = #tpu.pipeline_mode<synchronous>, transform_indices = @transform_0, window_bounds = array<i64: 2, 18, 72>}, {pipeline_mode = #tpu.pipeline_mode<synchronous>, transform_indices = @transform_1, window_bounds = array<i64: 3, 72, 128>}, {pipeline_mode = #tpu.pipeline_mode<synchronous>, transform_indices = @transform_2, window_bounds = array<i64: 1, 128>}, {pipeline_mode = #tpu.pipeline_mode<synchronous>, transform_indices = @transform_3, window_bounds = array<i64: 16, 128, 10>}, {pipeline_mode = #tpu.pipeline_mode<synchronous>, transform_indices = @transform_4, window_bounds = array<i64: 1, 10>}, {pipeline_mode = #tpu.pipeline_mode<synchronous>, transform_indices = @transform_5, window_bounds = array<i64: 2, 10>}]} {
    %c0 = arith.constant 0 : index
    %c0_0 = arith.constant 0 : index
    %0 = vector.load %arg3[%c0, %c0_0] : memref<1x128xf32, #tpu.memory_space<vmem>>, vector<1x128xf32>
    %c0_1 = arith.constant 0 : index
    %c0_2 = arith.constant 0 : index
    %1 = vector.load %arg5[%c0_1, %c0_2] : memref<1x10xf32, #tpu.memory_space<vmem>>, vector<1x10xf32>
    %c0_3 = arith.constant 0 : index
    %c0_4 = arith.constant 0 : index
    %c0_5 = arith.constant 0 : index
    %2 = vector.load %arg1[%c0_3, %c0_4, %c0_5] : memref<2x18x72xf32, #tpu.memory_space<vmem>>, vector<1x18x72xf32>
    %3 = vector.shape_cast %2 : vector<1x18x72xf32> to vector<18x72xf32>
    %cst = arith.constant 0.000000e+00 : f32
    %4 = vector.broadcast %cst : f32 to vector<16x128xf32>
    %5 = vector.extract_strided_slice %3 {offsets = [0, 0], sizes = [16, 72], strides = [1, 1]} : vector<18x72xf32> to vector<16x72xf32>
    %c0_6 = arith.constant 0 : index
    %c0_7 = arith.constant 0 : index
    %c0_8 = arith.constant 0 : index
    %6 = vector.load %arg2[%c0_6, %c0_7, %c0_8] : memref<3x72x128xf32, #tpu.memory_space<vmem>>, vector<1x72x128xf32>
    %7 = vector.shape_cast %6 : vector<1x72x128xf32> to vector<72x128xf32>
    %cst_9 = arith.constant dense<0.000000e+00> : vector<16x128xf32>
    %8 = tpu.matmul %5, %7, %cst_9 {dimension_numbers = #tpu.dot_dimension_numbers<[1], [0], [0], [1], [0, 0, 1, 1], [], []>} : vector<16x72xf32>, vector<72x128xf32>, vector<16x128xf32> -> vector<16x128xf32>
    %9 = arith.addf %4, %8 : vector<16x128xf32>
    %10 = vector.extract_strided_slice %3 {offsets = [1, 0], sizes = [16, 72], strides = [1, 1]} : vector<18x72xf32> to vector<16x72xf32>
    %c1 = arith.constant 1 : index
    %c0_10 = arith.constant 0 : index
    %c0_11 = arith.constant 0 : index
    %11 = vector.load %arg2[%c1, %c0_10, %c0_11] : memref<3x72x128xf32, #tpu.memory_space<vmem>>, vector<1x72x128xf32>
    %12 = vector.shape_cast %11 : vector<1x72x128xf32> to vector<72x128xf32>
    %cst_12 = arith.constant dense<0.000000e+00> : vector<16x128xf32>
    %13 = tpu.matmul %10, %12, %cst_12 {dimension_numbers = #tpu.dot_dimension_numbers<[1], [0], [0], [1], [0, 0, 1, 1], [], []>} : vector<16x72xf32>, vector<72x128xf32>, vector<16x128xf32> -> vector<16x128xf32>
    %14 = arith.addf %9, %13 : vector<16x128xf32>
    %15 = vector.extract_strided_slice %3 {offsets = [2, 0], sizes = [16, 72], strides = [1, 1]} : vector<18x72xf32> to vector<16x72xf32>
    %c2 = arith.constant 2 : index
    %c0_13 = arith.constant 0 : index
    %c0_14 = arith.constant 0 : index
    %16 = vector.load %arg2[%c2, %c0_13, %c0_14] : memref<3x72x128xf32, #tpu.memory_space<vmem>>, vector<1x72x128xf32>
    %17 = vector.shape_cast %16 : vector<1x72x128xf32> to vector<72x128xf32>
    %cst_15 = arith.constant dense<0.000000e+00> : vector<16x128xf32>
    %18 = tpu.matmul %15, %17, %cst_15 {dimension_numbers = #tpu.dot_dimension_numbers<[1], [0], [0], [1], [0, 0, 1, 1], [], []>} : vector<16x72xf32>, vector<72x128xf32>, vector<16x128xf32> -> vector<16x128xf32>
    %19 = arith.addf %14, %18 : vector<16x128xf32>
    %20 = vector.broadcast %0 : vector<1x128xf32> to vector<16x128xf32>
    %21 = arith.addf %19, %20 : vector<16x128xf32>
    %cst_16 = arith.constant 0.000000e+00 : f32
    %22 = vector.broadcast %cst_16 : f32 to vector<16x128xf32>
    %23 = arith.maximumf %21, %22 : vector<16x128xf32>
    %24 = vector.extract_strided_slice %23 {offsets = [0, 0], sizes = [1, 128], strides = [1, 1]} : vector<16x128xf32> to vector<1x128xf32>
    %c0_17 = arith.constant 0 : index
    %c0_18 = arith.constant 0 : index
    %c0_19 = arith.constant 0 : index
    %25 = vector.load %arg4[%c0_17, %c0_18, %c0_19] : memref<16x128x10xf32, #tpu.memory_space<vmem>>, vector<1x128x10xf32>
    %26 = vector.shape_cast %25 : vector<1x128x10xf32> to vector<128x10xf32>
    %cst_20 = arith.constant dense<0.000000e+00> : vector<1x10xf32>
    %27 = tpu.matmul %24, %26, %cst_20 {dimension_numbers = #tpu.dot_dimension_numbers<[1], [0], [0], [1], [0, 0, 1, 1], [], []>} : vector<1x128xf32>, vector<128x10xf32>, vector<1x10xf32> -> vector<1x10xf32>
    %28 = arith.addf %1, %27 : vector<1x10xf32>
    %29 = vector.extract_strided_slice %23 {offsets = [1, 0], sizes = [1, 128], strides = [1, 1]} : vector<16x128xf32> to vector<1x128xf32>
    %c1_21 = arith.constant 1 : index
    %c0_22 = arith.constant 0 : index
    %c0_23 = arith.constant 0 : index
    %30 = vector.load %arg4[%c1_21, %c0_22, %c0_23] : memref<16x128x10xf32, #tpu.memory_space<vmem>>, vector<1x128x10xf32>
    %31 = vector.shape_cast %30 : vector<1x128x10xf32> to vector<128x10xf32>
    %cst_24 = arith.constant dense<0.000000e+00> : vector<1x10xf32>
    %32 = tpu.matmul %29, %31, %cst_24 {dimension_numbers = #tpu.dot_dimension_numbers<[1], [0], [0], [1], [0, 0, 1, 1], [], []>} : vector<1x128xf32>, vector<128x10xf32>, vector<1x10xf32> -> vector<1x10xf32>
    %33 = arith.addf %28, %32 : vector<1x10xf32>
    %34 = vector.extract_strided_slice %23 {offsets = [2, 0], sizes = [1, 128], strides = [1, 1]} : vector<16x128xf32> to vector<1x128xf32>
    %c2_25 = arith.constant 2 : index
    %c0_26 = arith.constant 0 : index
    %c0_27 = arith.constant 0 : index
    %35 = vector.load %arg4[%c2_25, %c0_26, %c0_27] : memref<16x128x10xf32, #tpu.memory_space<vmem>>, vector<1x128x10xf32>
    %36 = vector.shape_cast %35 : vector<1x128x10xf32> to vector<128x10xf32>
    %cst_28 = arith.constant dense<0.000000e+00> : vector<1x10xf32>
    %37 = tpu.matmul %34, %36, %cst_28 {dimension_numbers = #tpu.dot_dimension_numbers<[1], [0], [0], [1], [0, 0, 1, 1], [], []>} : vector<1x128xf32>, vector<128x10xf32>, vector<1x10xf32> -> vector<1x10xf32>
    %38 = arith.addf %33, %37 : vector<1x10xf32>
    %39 = vector.extract_strided_slice %23 {offsets = [3, 0], sizes = [1, 128], strides = [1, 1]} : vector<16x128xf32> to vector<1x128xf32>
    %c3 = arith.constant 3 : index
    %c0_29 = arith.constant 0 : index
    %c0_30 = arith.constant 0 : index
    %40 = vector.load %arg4[%c3, %c0_29, %c0_30] : memref<16x128x10xf32, #tpu.memory_space<vmem>>, vector<1x128x10xf32>
    %41 = vector.shape_cast %40 : vector<1x128x10xf32> to vector<128x10xf32>
    %cst_31 = arith.constant dense<0.000000e+00> : vector<1x10xf32>
    %42 = tpu.matmul %39, %41, %cst_31 {dimension_numbers = #tpu.dot_dimension_numbers<[1], [0], [0], [1], [0, 0, 1, 1], [], []>} : vector<1x128xf32>, vector<128x10xf32>, vector<1x10xf32> -> vector<1x10xf32>
    %43 = arith.addf %38, %42 : vector<1x10xf32>
    %44 = vector.extract_strided_slice %23 {offsets = [4, 0], sizes = [1, 128], strides = [1, 1]} : vector<16x128xf32> to vector<1x128xf32>
    %c4 = arith.constant 4 : index
    %c0_32 = arith.constant 0 : index
    %c0_33 = arith.constant 0 : index
    %45 = vector.load %arg4[%c4, %c0_32, %c0_33] : memref<16x128x10xf32, #tpu.memory_space<vmem>>, vector<1x128x10xf32>
    %46 = vector.shape_cast %45 : vector<1x128x10xf32> to vector<128x10xf32>
    %cst_34 = arith.constant dense<0.000000e+00> : vector<1x10xf32>
    %47 = tpu.matmul %44, %46, %cst_34 {dimension_numbers = #tpu.dot_dimension_numbers<[1], [0], [0], [1], [0, 0, 1, 1], [], []>} : vector<1x128xf32>, vector<128x10xf32>, vector<1x10xf32> -> vector<1x10xf32>
    %48 = arith.addf %43, %47 : vector<1x10xf32>
    %49 = vector.extract_strided_slice %23 {offsets = [5, 0], sizes = [1, 128], strides = [1, 1]} : vector<16x128xf32> to vector<1x128xf32>
    %c5 = arith.constant 5 : index
    %c0_35 = arith.constant 0 : index
    %c0_36 = arith.constant 0 : index
    %50 = vector.load %arg4[%c5, %c0_35, %c0_36] : memref<16x128x10xf32, #tpu.memory_space<vmem>>, vector<1x128x10xf32>
    %51 = vector.shape_cast %50 : vector<1x128x10xf32> to vector<128x10xf32>
    %cst_37 = arith.constant dense<0.000000e+00> : vector<1x10xf32>
    %52 = tpu.matmul %49, %51, %cst_37 {dimension_numbers = #tpu.dot_dimension_numbers<[1], [0], [0], [1], [0, 0, 1, 1], [], []>} : vector<1x128xf32>, vector<128x10xf32>, vector<1x10xf32> -> vector<1x10xf32>
    %53 = arith.addf %48, %52 : vector<1x10xf32>
    %54 = vector.extract_strided_slice %23 {offsets = [6, 0], sizes = [1, 128], strides = [1, 1]} : vector<16x128xf32> to vector<1x128xf32>
    %c6 = arith.constant 6 : index
    %c0_38 = arith.constant 0 : index
    %c0_39 = arith.constant 0 : index
    %55 = vector.load %arg4[%c6, %c0_38, %c0_39] : memref<16x128x10xf32, #tpu.memory_space<vmem>>, vector<1x128x10xf32>
    %56 = vector.shape_cast %55 : vector<1x128x10xf32> to vector<128x10xf32>
    %cst_40 = arith.constant dense<0.000000e+00> : vector<1x10xf32>
    %57 = tpu.matmul %54, %56, %cst_40 {dimension_numbers = #tpu.dot_dimension_numbers<[1], [0], [0], [1], [0, 0, 1, 1], [], []>} : vector<1x128xf32>, vector<128x10xf32>, vector<1x10xf32> -> vector<1x10xf32>
    %58 = arith.addf %53, %57 : vector<1x10xf32>
    %59 = vector.extract_strided_slice %23 {offsets = [7, 0], sizes = [1, 128], strides = [1, 1]} : vector<16x128xf32> to vector<1x128xf32>
    %c7 = arith.constant 7 : index
    %c0_41 = arith.constant 0 : index
    %c0_42 = arith.constant 0 : index
    %60 = vector.load %arg4[%c7, %c0_41, %c0_42] : memref<16x128x10xf32, #tpu.memory_space<vmem>>, vector<1x128x10xf32>
    %61 = vector.shape_cast %60 : vector<1x128x10xf32> to vector<128x10xf32>
    %cst_43 = arith.constant dense<0.000000e+00> : vector<1x10xf32>
    %62 = tpu.matmul %59, %61, %cst_43 {dimension_numbers = #tpu.dot_dimension_numbers<[1], [0], [0], [1], [0, 0, 1, 1], [], []>} : vector<1x128xf32>, vector<128x10xf32>, vector<1x10xf32> -> vector<1x10xf32>
    %63 = arith.addf %58, %62 : vector<1x10xf32>
    %64 = vector.extract_strided_slice %23 {offsets = [8, 0], sizes = [1, 128], strides = [1, 1]} : vector<16x128xf32> to vector<1x128xf32>
    %c8 = arith.constant 8 : index
    %c0_44 = arith.constant 0 : index
    %c0_45 = arith.constant 0 : index
    %65 = vector.load %arg4[%c8, %c0_44, %c0_45] : memref<16x128x10xf32, #tpu.memory_space<vmem>>, vector<1x128x10xf32>
    %66 = vector.shape_cast %65 : vector<1x128x10xf32> to vector<128x10xf32>
    %cst_46 = arith.constant dense<0.000000e+00> : vector<1x10xf32>
    %67 = tpu.matmul %64, %66, %cst_46 {dimension_numbers = #tpu.dot_dimension_numbers<[1], [0], [0], [1], [0, 0, 1, 1], [], []>} : vector<1x128xf32>, vector<128x10xf32>, vector<1x10xf32> -> vector<1x10xf32>
    %68 = arith.addf %63, %67 : vector<1x10xf32>
    %69 = vector.extract_strided_slice %23 {offsets = [9, 0], sizes = [1, 128], strides = [1, 1]} : vector<16x128xf32> to vector<1x128xf32>
    %c9 = arith.constant 9 : index
    %c0_47 = arith.constant 0 : index
    %c0_48 = arith.constant 0 : index
    %70 = vector.load %arg4[%c9, %c0_47, %c0_48] : memref<16x128x10xf32, #tpu.memory_space<vmem>>, vector<1x128x10xf32>
    %71 = vector.shape_cast %70 : vector<1x128x10xf32> to vector<128x10xf32>
    %cst_49 = arith.constant dense<0.000000e+00> : vector<1x10xf32>
    %72 = tpu.matmul %69, %71, %cst_49 {dimension_numbers = #tpu.dot_dimension_numbers<[1], [0], [0], [1], [0, 0, 1, 1], [], []>} : vector<1x128xf32>, vector<128x10xf32>, vector<1x10xf32> -> vector<1x10xf32>
    %73 = arith.addf %68, %72 : vector<1x10xf32>
    %74 = vector.extract_strided_slice %23 {offsets = [10, 0], sizes = [1, 128], strides = [1, 1]} : vector<16x128xf32> to vector<1x128xf32>
    %c10 = arith.constant 10 : index
    %c0_50 = arith.constant 0 : index
    %c0_51 = arith.constant 0 : index
    %75 = vector.load %arg4[%c10, %c0_50, %c0_51] : memref<16x128x10xf32, #tpu.memory_space<vmem>>, vector<1x128x10xf32>
    %76 = vector.shape_cast %75 : vector<1x128x10xf32> to vector<128x10xf32>
    %cst_52 = arith.constant dense<0.000000e+00> : vector<1x10xf32>
    %77 = tpu.matmul %74, %76, %cst_52 {dimension_numbers = #tpu.dot_dimension_numbers<[1], [0], [0], [1], [0, 0, 1, 1], [], []>} : vector<1x128xf32>, vector<128x10xf32>, vector<1x10xf32> -> vector<1x10xf32>
    %78 = arith.addf %73, %77 : vector<1x10xf32>
    %79 = vector.extract_strided_slice %23 {offsets = [11, 0], sizes = [1, 128], strides = [1, 1]} : vector<16x128xf32> to vector<1x128xf32>
    %c11 = arith.constant 11 : index
    %c0_53 = arith.constant 0 : index
    %c0_54 = arith.constant 0 : index
    %80 = vector.load %arg4[%c11, %c0_53, %c0_54] : memref<16x128x10xf32, #tpu.memory_space<vmem>>, vector<1x128x10xf32>
    %81 = vector.shape_cast %80 : vector<1x128x10xf32> to vector<128x10xf32>
    %cst_55 = arith.constant dense<0.000000e+00> : vector<1x10xf32>
    %82 = tpu.matmul %79, %81, %cst_55 {dimension_numbers = #tpu.dot_dimension_numbers<[1], [0], [0], [1], [0, 0, 1, 1], [], []>} : vector<1x128xf32>, vector<128x10xf32>, vector<1x10xf32> -> vector<1x10xf32>
    %83 = arith.addf %78, %82 : vector<1x10xf32>
    %84 = vector.extract_strided_slice %23 {offsets = [12, 0], sizes = [1, 128], strides = [1, 1]} : vector<16x128xf32> to vector<1x128xf32>
    %c12 = arith.constant 12 : index
    %c0_56 = arith.constant 0 : index
    %c0_57 = arith.constant 0 : index
    %85 = vector.load %arg4[%c12, %c0_56, %c0_57] : memref<16x128x10xf32, #tpu.memory_space<vmem>>, vector<1x128x10xf32>
    %86 = vector.shape_cast %85 : vector<1x128x10xf32> to vector<128x10xf32>
    %cst_58 = arith.constant dense<0.000000e+00> : vector<1x10xf32>
    %87 = tpu.matmul %84, %86, %cst_58 {dimension_numbers = #tpu.dot_dimension_numbers<[1], [0], [0], [1], [0, 0, 1, 1], [], []>} : vector<1x128xf32>, vector<128x10xf32>, vector<1x10xf32> -> vector<1x10xf32>
    %88 = arith.addf %83, %87 : vector<1x10xf32>
    %89 = vector.extract_strided_slice %23 {offsets = [13, 0], sizes = [1, 128], strides = [1, 1]} : vector<16x128xf32> to vector<1x128xf32>
    %c13 = arith.constant 13 : index
    %c0_59 = arith.constant 0 : index
    %c0_60 = arith.constant 0 : index
    %90 = vector.load %arg4[%c13, %c0_59, %c0_60] : memref<16x128x10xf32, #tpu.memory_space<vmem>>, vector<1x128x10xf32>
    %91 = vector.shape_cast %90 : vector<1x128x10xf32> to vector<128x10xf32>
    %cst_61 = arith.constant dense<0.000000e+00> : vector<1x10xf32>
    %92 = tpu.matmul %89, %91, %cst_61 {dimension_numbers = #tpu.dot_dimension_numbers<[1], [0], [0], [1], [0, 0, 1, 1], [], []>} : vector<1x128xf32>, vector<128x10xf32>, vector<1x10xf32> -> vector<1x10xf32>
    %93 = arith.addf %88, %92 : vector<1x10xf32>
    %94 = vector.extract_strided_slice %23 {offsets = [14, 0], sizes = [1, 128], strides = [1, 1]} : vector<16x128xf32> to vector<1x128xf32>
    %c14 = arith.constant 14 : index
    %c0_62 = arith.constant 0 : index
    %c0_63 = arith.constant 0 : index
    %95 = vector.load %arg4[%c14, %c0_62, %c0_63] : memref<16x128x10xf32, #tpu.memory_space<vmem>>, vector<1x128x10xf32>
    %96 = vector.shape_cast %95 : vector<1x128x10xf32> to vector<128x10xf32>
    %cst_64 = arith.constant dense<0.000000e+00> : vector<1x10xf32>
    %97 = tpu.matmul %94, %96, %cst_64 {dimension_numbers = #tpu.dot_dimension_numbers<[1], [0], [0], [1], [0, 0, 1, 1], [], []>} : vector<1x128xf32>, vector<128x10xf32>, vector<1x10xf32> -> vector<1x10xf32>
    %98 = arith.addf %93, %97 : vector<1x10xf32>
    %99 = vector.extract_strided_slice %23 {offsets = [15, 0], sizes = [1, 128], strides = [1, 1]} : vector<16x128xf32> to vector<1x128xf32>
    %c15 = arith.constant 15 : index
    %c0_65 = arith.constant 0 : index
    %c0_66 = arith.constant 0 : index
    %100 = vector.load %arg4[%c15, %c0_65, %c0_66] : memref<16x128x10xf32, #tpu.memory_space<vmem>>, vector<1x128x10xf32>
    %101 = vector.shape_cast %100 : vector<1x128x10xf32> to vector<128x10xf32>
    %cst_67 = arith.constant dense<0.000000e+00> : vector<1x10xf32>
    %102 = tpu.matmul %99, %101, %cst_67 {dimension_numbers = #tpu.dot_dimension_numbers<[1], [0], [0], [1], [0, 0, 1, 1], [], []>} : vector<1x128xf32>, vector<128x10xf32>, vector<1x10xf32> -> vector<1x10xf32>
    %103 = arith.addf %98, %102 : vector<1x10xf32>
    %c1_68 = arith.constant 1 : index
    %c0_69 = arith.constant 0 : index
    %c0_70 = arith.constant 0 : index
    %104 = vector.load %arg1[%c1_68, %c0_69, %c0_70] : memref<2x18x72xf32, #tpu.memory_space<vmem>>, vector<1x18x72xf32>
    %105 = vector.shape_cast %104 : vector<1x18x72xf32> to vector<18x72xf32>
    %cst_71 = arith.constant 0.000000e+00 : f32
    %106 = vector.broadcast %cst_71 : f32 to vector<16x128xf32>
    %107 = vector.extract_strided_slice %105 {offsets = [0, 0], sizes = [16, 72], strides = [1, 1]} : vector<18x72xf32> to vector<16x72xf32>
    %c0_72 = arith.constant 0 : index
    %c0_73 = arith.constant 0 : index
    %c0_74 = arith.constant 0 : index
    %108 = vector.load %arg2[%c0_72, %c0_73, %c0_74] : memref<3x72x128xf32, #tpu.memory_space<vmem>>, vector<1x72x128xf32>
    %109 = vector.shape_cast %108 : vector<1x72x128xf32> to vector<72x128xf32>
    %cst_75 = arith.constant dense<0.000000e+00> : vector<16x128xf32>
    %110 = tpu.matmul %107, %109, %cst_75 {dimension_numbers = #tpu.dot_dimension_numbers<[1], [0], [0], [1], [0, 0, 1, 1], [], []>} : vector<16x72xf32>, vector<72x128xf32>, vector<16x128xf32> -> vector<16x128xf32>
    %111 = arith.addf %106, %110 : vector<16x128xf32>
    %112 = vector.extract_strided_slice %105 {offsets = [1, 0], sizes = [16, 72], strides = [1, 1]} : vector<18x72xf32> to vector<16x72xf32>
    %c1_76 = arith.constant 1 : index
    %c0_77 = arith.constant 0 : index
    %c0_78 = arith.constant 0 : index
    %113 = vector.load %arg2[%c1_76, %c0_77, %c0_78] : memref<3x72x128xf32, #tpu.memory_space<vmem>>, vector<1x72x128xf32>
    %114 = vector.shape_cast %113 : vector<1x72x128xf32> to vector<72x128xf32>
    %cst_79 = arith.constant dense<0.000000e+00> : vector<16x128xf32>
    %115 = tpu.matmul %112, %114, %cst_79 {dimension_numbers = #tpu.dot_dimension_numbers<[1], [0], [0], [1], [0, 0, 1, 1], [], []>} : vector<16x72xf32>, vector<72x128xf32>, vector<16x128xf32> -> vector<16x128xf32>
    %116 = arith.addf %111, %115 : vector<16x128xf32>
    %117 = vector.extract_strided_slice %105 {offsets = [2, 0], sizes = [16, 72], strides = [1, 1]} : vector<18x72xf32> to vector<16x72xf32>
    %c2_80 = arith.constant 2 : index
    %c0_81 = arith.constant 0 : index
    %c0_82 = arith.constant 0 : index
    %118 = vector.load %arg2[%c2_80, %c0_81, %c0_82] : memref<3x72x128xf32, #tpu.memory_space<vmem>>, vector<1x72x128xf32>
    %119 = vector.shape_cast %118 : vector<1x72x128xf32> to vector<72x128xf32>
    %cst_83 = arith.constant dense<0.000000e+00> : vector<16x128xf32>
    %120 = tpu.matmul %117, %119, %cst_83 {dimension_numbers = #tpu.dot_dimension_numbers<[1], [0], [0], [1], [0, 0, 1, 1], [], []>} : vector<16x72xf32>, vector<72x128xf32>, vector<16x128xf32> -> vector<16x128xf32>
    %121 = arith.addf %116, %120 : vector<16x128xf32>
    %122 = vector.broadcast %0 : vector<1x128xf32> to vector<16x128xf32>
    %123 = arith.addf %121, %122 : vector<16x128xf32>
    %cst_84 = arith.constant 0.000000e+00 : f32
    %124 = vector.broadcast %cst_84 : f32 to vector<16x128xf32>
    %125 = arith.maximumf %123, %124 : vector<16x128xf32>
    %126 = vector.extract_strided_slice %125 {offsets = [0, 0], sizes = [1, 128], strides = [1, 1]} : vector<16x128xf32> to vector<1x128xf32>
    %c0_85 = arith.constant 0 : index
    %c0_86 = arith.constant 0 : index
    %c0_87 = arith.constant 0 : index
    %127 = vector.load %arg4[%c0_85, %c0_86, %c0_87] : memref<16x128x10xf32, #tpu.memory_space<vmem>>, vector<1x128x10xf32>
    %128 = vector.shape_cast %127 : vector<1x128x10xf32> to vector<128x10xf32>
    %cst_88 = arith.constant dense<0.000000e+00> : vector<1x10xf32>
    %129 = tpu.matmul %126, %128, %cst_88 {dimension_numbers = #tpu.dot_dimension_numbers<[1], [0], [0], [1], [0, 0, 1, 1], [], []>} : vector<1x128xf32>, vector<128x10xf32>, vector<1x10xf32> -> vector<1x10xf32>
    %130 = arith.addf %1, %129 : vector<1x10xf32>
    %131 = vector.extract_strided_slice %125 {offsets = [1, 0], sizes = [1, 128], strides = [1, 1]} : vector<16x128xf32> to vector<1x128xf32>
    %c1_89 = arith.constant 1 : index
    %c0_90 = arith.constant 0 : index
    %c0_91 = arith.constant 0 : index
    %132 = vector.load %arg4[%c1_89, %c0_90, %c0_91] : memref<16x128x10xf32, #tpu.memory_space<vmem>>, vector<1x128x10xf32>
    %133 = vector.shape_cast %132 : vector<1x128x10xf32> to vector<128x10xf32>
    %cst_92 = arith.constant dense<0.000000e+00> : vector<1x10xf32>
    %134 = tpu.matmul %131, %133, %cst_92 {dimension_numbers = #tpu.dot_dimension_numbers<[1], [0], [0], [1], [0, 0, 1, 1], [], []>} : vector<1x128xf32>, vector<128x10xf32>, vector<1x10xf32> -> vector<1x10xf32>
    %135 = arith.addf %130, %134 : vector<1x10xf32>
    %136 = vector.extract_strided_slice %125 {offsets = [2, 0], sizes = [1, 128], strides = [1, 1]} : vector<16x128xf32> to vector<1x128xf32>
    %c2_93 = arith.constant 2 : index
    %c0_94 = arith.constant 0 : index
    %c0_95 = arith.constant 0 : index
    %137 = vector.load %arg4[%c2_93, %c0_94, %c0_95] : memref<16x128x10xf32, #tpu.memory_space<vmem>>, vector<1x128x10xf32>
    %138 = vector.shape_cast %137 : vector<1x128x10xf32> to vector<128x10xf32>
    %cst_96 = arith.constant dense<0.000000e+00> : vector<1x10xf32>
    %139 = tpu.matmul %136, %138, %cst_96 {dimension_numbers = #tpu.dot_dimension_numbers<[1], [0], [0], [1], [0, 0, 1, 1], [], []>} : vector<1x128xf32>, vector<128x10xf32>, vector<1x10xf32> -> vector<1x10xf32>
    %140 = arith.addf %135, %139 : vector<1x10xf32>
    %141 = vector.extract_strided_slice %125 {offsets = [3, 0], sizes = [1, 128], strides = [1, 1]} : vector<16x128xf32> to vector<1x128xf32>
    %c3_97 = arith.constant 3 : index
    %c0_98 = arith.constant 0 : index
    %c0_99 = arith.constant 0 : index
    %142 = vector.load %arg4[%c3_97, %c0_98, %c0_99] : memref<16x128x10xf32, #tpu.memory_space<vmem>>, vector<1x128x10xf32>
    %143 = vector.shape_cast %142 : vector<1x128x10xf32> to vector<128x10xf32>
    %cst_100 = arith.constant dense<0.000000e+00> : vector<1x10xf32>
    %144 = tpu.matmul %141, %143, %cst_100 {dimension_numbers = #tpu.dot_dimension_numbers<[1], [0], [0], [1], [0, 0, 1, 1], [], []>} : vector<1x128xf32>, vector<128x10xf32>, vector<1x10xf32> -> vector<1x10xf32>
    %145 = arith.addf %140, %144 : vector<1x10xf32>
    %146 = vector.extract_strided_slice %125 {offsets = [4, 0], sizes = [1, 128], strides = [1, 1]} : vector<16x128xf32> to vector<1x128xf32>
    %c4_101 = arith.constant 4 : index
    %c0_102 = arith.constant 0 : index
    %c0_103 = arith.constant 0 : index
    %147 = vector.load %arg4[%c4_101, %c0_102, %c0_103] : memref<16x128x10xf32, #tpu.memory_space<vmem>>, vector<1x128x10xf32>
    %148 = vector.shape_cast %147 : vector<1x128x10xf32> to vector<128x10xf32>
    %cst_104 = arith.constant dense<0.000000e+00> : vector<1x10xf32>
    %149 = tpu.matmul %146, %148, %cst_104 {dimension_numbers = #tpu.dot_dimension_numbers<[1], [0], [0], [1], [0, 0, 1, 1], [], []>} : vector<1x128xf32>, vector<128x10xf32>, vector<1x10xf32> -> vector<1x10xf32>
    %150 = arith.addf %145, %149 : vector<1x10xf32>
    %151 = vector.extract_strided_slice %125 {offsets = [5, 0], sizes = [1, 128], strides = [1, 1]} : vector<16x128xf32> to vector<1x128xf32>
    %c5_105 = arith.constant 5 : index
    %c0_106 = arith.constant 0 : index
    %c0_107 = arith.constant 0 : index
    %152 = vector.load %arg4[%c5_105, %c0_106, %c0_107] : memref<16x128x10xf32, #tpu.memory_space<vmem>>, vector<1x128x10xf32>
    %153 = vector.shape_cast %152 : vector<1x128x10xf32> to vector<128x10xf32>
    %cst_108 = arith.constant dense<0.000000e+00> : vector<1x10xf32>
    %154 = tpu.matmul %151, %153, %cst_108 {dimension_numbers = #tpu.dot_dimension_numbers<[1], [0], [0], [1], [0, 0, 1, 1], [], []>} : vector<1x128xf32>, vector<128x10xf32>, vector<1x10xf32> -> vector<1x10xf32>
    %155 = arith.addf %150, %154 : vector<1x10xf32>
    %156 = vector.extract_strided_slice %125 {offsets = [6, 0], sizes = [1, 128], strides = [1, 1]} : vector<16x128xf32> to vector<1x128xf32>
    %c6_109 = arith.constant 6 : index
    %c0_110 = arith.constant 0 : index
    %c0_111 = arith.constant 0 : index
    %157 = vector.load %arg4[%c6_109, %c0_110, %c0_111] : memref<16x128x10xf32, #tpu.memory_space<vmem>>, vector<1x128x10xf32>
    %158 = vector.shape_cast %157 : vector<1x128x10xf32> to vector<128x10xf32>
    %cst_112 = arith.constant dense<0.000000e+00> : vector<1x10xf32>
    %159 = tpu.matmul %156, %158, %cst_112 {dimension_numbers = #tpu.dot_dimension_numbers<[1], [0], [0], [1], [0, 0, 1, 1], [], []>} : vector<1x128xf32>, vector<128x10xf32>, vector<1x10xf32> -> vector<1x10xf32>
    %160 = arith.addf %155, %159 : vector<1x10xf32>
    %161 = vector.extract_strided_slice %125 {offsets = [7, 0], sizes = [1, 128], strides = [1, 1]} : vector<16x128xf32> to vector<1x128xf32>
    %c7_113 = arith.constant 7 : index
    %c0_114 = arith.constant 0 : index
    %c0_115 = arith.constant 0 : index
    %162 = vector.load %arg4[%c7_113, %c0_114, %c0_115] : memref<16x128x10xf32, #tpu.memory_space<vmem>>, vector<1x128x10xf32>
    %163 = vector.shape_cast %162 : vector<1x128x10xf32> to vector<128x10xf32>
    %cst_116 = arith.constant dense<0.000000e+00> : vector<1x10xf32>
    %164 = tpu.matmul %161, %163, %cst_116 {dimension_numbers = #tpu.dot_dimension_numbers<[1], [0], [0], [1], [0, 0, 1, 1], [], []>} : vector<1x128xf32>, vector<128x10xf32>, vector<1x10xf32> -> vector<1x10xf32>
    %165 = arith.addf %160, %164 : vector<1x10xf32>
    %166 = vector.extract_strided_slice %125 {offsets = [8, 0], sizes = [1, 128], strides = [1, 1]} : vector<16x128xf32> to vector<1x128xf32>
    %c8_117 = arith.constant 8 : index
    %c0_118 = arith.constant 0 : index
    %c0_119 = arith.constant 0 : index
    %167 = vector.load %arg4[%c8_117, %c0_118, %c0_119] : memref<16x128x10xf32, #tpu.memory_space<vmem>>, vector<1x128x10xf32>
    %168 = vector.shape_cast %167 : vector<1x128x10xf32> to vector<128x10xf32>
    %cst_120 = arith.constant dense<0.000000e+00> : vector<1x10xf32>
    %169 = tpu.matmul %166, %168, %cst_120 {dimension_numbers = #tpu.dot_dimension_numbers<[1], [0], [0], [1], [0, 0, 1, 1], [], []>} : vector<1x128xf32>, vector<128x10xf32>, vector<1x10xf32> -> vector<1x10xf32>
    %170 = arith.addf %165, %169 : vector<1x10xf32>
    %171 = vector.extract_strided_slice %125 {offsets = [9, 0], sizes = [1, 128], strides = [1, 1]} : vector<16x128xf32> to vector<1x128xf32>
    %c9_121 = arith.constant 9 : index
    %c0_122 = arith.constant 0 : index
    %c0_123 = arith.constant 0 : index
    %172 = vector.load %arg4[%c9_121, %c0_122, %c0_123] : memref<16x128x10xf32, #tpu.memory_space<vmem>>, vector<1x128x10xf32>
    %173 = vector.shape_cast %172 : vector<1x128x10xf32> to vector<128x10xf32>
    %cst_124 = arith.constant dense<0.000000e+00> : vector<1x10xf32>
    %174 = tpu.matmul %171, %173, %cst_124 {dimension_numbers = #tpu.dot_dimension_numbers<[1], [0], [0], [1], [0, 0, 1, 1], [], []>} : vector<1x128xf32>, vector<128x10xf32>, vector<1x10xf32> -> vector<1x10xf32>
    %175 = arith.addf %170, %174 : vector<1x10xf32>
    %176 = vector.extract_strided_slice %125 {offsets = [10, 0], sizes = [1, 128], strides = [1, 1]} : vector<16x128xf32> to vector<1x128xf32>
    %c10_125 = arith.constant 10 : index
    %c0_126 = arith.constant 0 : index
    %c0_127 = arith.constant 0 : index
    %177 = vector.load %arg4[%c10_125, %c0_126, %c0_127] : memref<16x128x10xf32, #tpu.memory_space<vmem>>, vector<1x128x10xf32>
    %178 = vector.shape_cast %177 : vector<1x128x10xf32> to vector<128x10xf32>
    %cst_128 = arith.constant dense<0.000000e+00> : vector<1x10xf32>
    %179 = tpu.matmul %176, %178, %cst_128 {dimension_numbers = #tpu.dot_dimension_numbers<[1], [0], [0], [1], [0, 0, 1, 1], [], []>} : vector<1x128xf32>, vector<128x10xf32>, vector<1x10xf32> -> vector<1x10xf32>
    %180 = arith.addf %175, %179 : vector<1x10xf32>
    %181 = vector.extract_strided_slice %125 {offsets = [11, 0], sizes = [1, 128], strides = [1, 1]} : vector<16x128xf32> to vector<1x128xf32>
    %c11_129 = arith.constant 11 : index
    %c0_130 = arith.constant 0 : index
    %c0_131 = arith.constant 0 : index
    %182 = vector.load %arg4[%c11_129, %c0_130, %c0_131] : memref<16x128x10xf32, #tpu.memory_space<vmem>>, vector<1x128x10xf32>
    %183 = vector.shape_cast %182 : vector<1x128x10xf32> to vector<128x10xf32>
    %cst_132 = arith.constant dense<0.000000e+00> : vector<1x10xf32>
    %184 = tpu.matmul %181, %183, %cst_132 {dimension_numbers = #tpu.dot_dimension_numbers<[1], [0], [0], [1], [0, 0, 1, 1], [], []>} : vector<1x128xf32>, vector<128x10xf32>, vector<1x10xf32> -> vector<1x10xf32>
    %185 = arith.addf %180, %184 : vector<1x10xf32>
    %186 = vector.extract_strided_slice %125 {offsets = [12, 0], sizes = [1, 128], strides = [1, 1]} : vector<16x128xf32> to vector<1x128xf32>
    %c12_133 = arith.constant 12 : index
    %c0_134 = arith.constant 0 : index
    %c0_135 = arith.constant 0 : index
    %187 = vector.load %arg4[%c12_133, %c0_134, %c0_135] : memref<16x128x10xf32, #tpu.memory_space<vmem>>, vector<1x128x10xf32>
    %188 = vector.shape_cast %187 : vector<1x128x10xf32> to vector<128x10xf32>
    %cst_136 = arith.constant dense<0.000000e+00> : vector<1x10xf32>
    %189 = tpu.matmul %186, %188, %cst_136 {dimension_numbers = #tpu.dot_dimension_numbers<[1], [0], [0], [1], [0, 0, 1, 1], [], []>} : vector<1x128xf32>, vector<128x10xf32>, vector<1x10xf32> -> vector<1x10xf32>
    %190 = arith.addf %185, %189 : vector<1x10xf32>
    %191 = vector.extract_strided_slice %125 {offsets = [13, 0], sizes = [1, 128], strides = [1, 1]} : vector<16x128xf32> to vector<1x128xf32>
    %c13_137 = arith.constant 13 : index
    %c0_138 = arith.constant 0 : index
    %c0_139 = arith.constant 0 : index
    %192 = vector.load %arg4[%c13_137, %c0_138, %c0_139] : memref<16x128x10xf32, #tpu.memory_space<vmem>>, vector<1x128x10xf32>
    %193 = vector.shape_cast %192 : vector<1x128x10xf32> to vector<128x10xf32>
    %cst_140 = arith.constant dense<0.000000e+00> : vector<1x10xf32>
    %194 = tpu.matmul %191, %193, %cst_140 {dimension_numbers = #tpu.dot_dimension_numbers<[1], [0], [0], [1], [0, 0, 1, 1], [], []>} : vector<1x128xf32>, vector<128x10xf32>, vector<1x10xf32> -> vector<1x10xf32>
    %195 = arith.addf %190, %194 : vector<1x10xf32>
    %196 = vector.extract_strided_slice %125 {offsets = [14, 0], sizes = [1, 128], strides = [1, 1]} : vector<16x128xf32> to vector<1x128xf32>
    %c14_141 = arith.constant 14 : index
    %c0_142 = arith.constant 0 : index
    %c0_143 = arith.constant 0 : index
    %197 = vector.load %arg4[%c14_141, %c0_142, %c0_143] : memref<16x128x10xf32, #tpu.memory_space<vmem>>, vector<1x128x10xf32>
    %198 = vector.shape_cast %197 : vector<1x128x10xf32> to vector<128x10xf32>
    %cst_144 = arith.constant dense<0.000000e+00> : vector<1x10xf32>
    %199 = tpu.matmul %196, %198, %cst_144 {dimension_numbers = #tpu.dot_dimension_numbers<[1], [0], [0], [1], [0, 0, 1, 1], [], []>} : vector<1x128xf32>, vector<128x10xf32>, vector<1x10xf32> -> vector<1x10xf32>
    %200 = arith.addf %195, %199 : vector<1x10xf32>
    %201 = vector.extract_strided_slice %125 {offsets = [15, 0], sizes = [1, 128], strides = [1, 1]} : vector<16x128xf32> to vector<1x128xf32>
    %c15_145 = arith.constant 15 : index
    %c0_146 = arith.constant 0 : index
    %c0_147 = arith.constant 0 : index
    %202 = vector.load %arg4[%c15_145, %c0_146, %c0_147] : memref<16x128x10xf32, #tpu.memory_space<vmem>>, vector<1x128x10xf32>
    %203 = vector.shape_cast %202 : vector<1x128x10xf32> to vector<128x10xf32>
    %cst_148 = arith.constant dense<0.000000e+00> : vector<1x10xf32>
    %204 = tpu.matmul %201, %203, %cst_148 {dimension_numbers = #tpu.dot_dimension_numbers<[1], [0], [0], [1], [0, 0, 1, 1], [], []>} : vector<1x128xf32>, vector<128x10xf32>, vector<1x10xf32> -> vector<1x10xf32>
    %205 = arith.addf %200, %204 : vector<1x10xf32>
    %206 = tpu.concatenate %103, %205 in 0 : vector<1x10xf32>, vector<1x10xf32> -> vector<2x10xf32>
    %c0_149 = arith.constant 0 : index
    %c0_150 = arith.constant 0 : index
    %207 = vector.load %arg6[%c0_149, %c0_150] : memref<2x10xf32, #tpu.memory_space<vmem>>, vector<2x10xf32>
    tpu.vector_store %arg6[%c0_149, %c0_150], %206 {strides = array<i32>} : memref<2x10xf32, #tpu.memory_space<vmem>>, vector<2x10xf32>,
    return
  }
  func.func @transform_0(%arg0: i32) -> (i32, i32, i32) {
    %c0_i32 = arith.constant 0 : i32
    %c0_i32_0 = arith.constant 0 : i32
    %c0_i32_1 = arith.constant 0 : i32
    %c0_i32_2 = arith.constant 0 : i32
    return %c0_i32, %c0_i32_0, %c0_i32_1 : i32, i32, i32
  }
  func.func @transform_1(%arg0: i32) -> (i32, i32, i32) {
    %c0_i32 = arith.constant 0 : i32
    %c0_i32_0 = arith.constant 0 : i32
    %c0_i32_1 = arith.constant 0 : i32
    %c0_i32_2 = arith.constant 0 : i32
    return %c0_i32, %c0_i32_0, %c0_i32_1 : i32, i32, i32
  }
  func.func @transform_2(%arg0: i32) -> (i32, i32) {
    %c0_i32 = arith.constant 0 : i32
    %c0_i32_0 = arith.constant 0 : i32
    %c0_i32_1 = arith.constant 0 : i32
    return %c0_i32, %c0_i32_0 : i32, i32
  }
  func.func @transform_3(%arg0: i32) -> (i32, i32, i32) {
    %c0_i32 = arith.constant 0 : i32
    %c0_i32_0 = arith.constant 0 : i32
    %c0_i32_1 = arith.constant 0 : i32
    %c0_i32_2 = arith.constant 0 : i32
    return %c0_i32, %c0_i32_0, %c0_i32_1 : i32, i32, i32
  }
  func.func @transform_4(%arg0: i32) -> (i32, i32) {
    %c0_i32 = arith.constant 0 : i32
    %c0_i32_0 = arith.constant 0 : i32
    %c0_i32_1 = arith.constant 0 : i32
    return %c0_i32, %c0_i32_0 : i32, i32
  }
  func.func @transform_5(%arg0: i32) -> (i32, i32) {
    %c0_i32 = arith.constant 0 : i32
    %c0_i32_0 = arith.constant 0 : i32
    %c0_i32_1 = arith.constant 0 : i32
    return %c0_i32, %c0_i32_0 : i32, i32
  }
}

</mosaic_0001>

<bundles_post_ra>
// kernel: quantized_model_forward.1
= control target key start
LH: loop header
LB: loop body
LE: loop exit
PB: predicated region body
PF: predicated region fallthrough
CT: control target
= control target key end

     0   :  { %vm54_vm0 = vcmask 588800   ;;  %vm48_vm1 = vcmask 1046528   ;;  %s7748_s0 = inlined_call_operand.vmem [shape: f32[2,18,72], index: 0, kind: input, shape index: {}]   ;;  %s7749_s1 = inlined_call_operand.vmem [shape: f32[3,72,128], index: 1, kind: input, shape index: {}]   ;;  %s7750_s2 = inlined_call_operand.vmem [shape: f32[1,128], index: 2, kind: input, shape index: {}]   ;;  %s7751_s3 = inlined_call_operand.vmem [shape: f32[16,128,10], index: 3, kind: input, shape index: {}]   ;;  %s7752_s4 = inlined_call_operand.vmem [shape: f32[1,10], index: 4, kind: input, shape index: {}]   ;;  %s7753_s5 = inlined_call_operand.hbm [shape: f32[2,10], index: 5, kind: output, shape index: {}]  }
   0x1   :  { %v26_v0 = vld [vmem:[%s7749_s1] sm:$0xff]  ;;  %v27_v1 = vld [vmem:[%s7749_s1 + $0x8] sm:$0xff]  ;;  %v28_v2 = vld [vmem:[%s7749_s1 + $0x10] sm:$0xff] }
   0x2   :  { %v6341_v3 = vpack.c.bf16 %v27_v1, %v26_v0  ;;  %v29_v4 = vld [vmem:[%s7749_s1 + $0x18] sm:$0xff]  ;;  %v30_v6 = vld [vmem:[%s7749_s1 + $0x20] sm:$0xff]  ;;  %v31_v7 = vld [vmem:[%s7749_s1 + $0x28] sm:$0xff] }
   0x3   :  { %v6346_v5 = vpack.c.bf16 %v29_v4, %v28_v2  ;;  %v3207_v8 = vld [vmem:[%s7749_s1 + $0x48] sm:$0xff]  ;;  %v3208_v9 = vld [vmem:[%s7749_s1 + $0x50] sm:$0xff]  ;;  %v23_v10 = vld [vmem:[%s7748_s0] sm:$0xff]  ;;  %v6374_v14 = vpack.c.bf16 %v31_v7, %v30_v6 }
   0x4   :  { %5354 = vmatprep.subr.bf16.mxu0 %v6341_v3  ;;  %v6365_v11 = vpack.c.bf16 %v3208_v9, %v3207_v8  ;;  %v49_v12 = vrot.slane %v23_v10, 1  ;;  %4130 = vmatprep.mubr.msk.f32.mxu0 %vm54_vm0, %v23_v10  ;;  %v6371_v13 = vld [vmem:[%s7748_s0 + $0x8] sm:$0xff]  ;;  %v32_v15 = vld [vmem:[%s7749_s1 + $0x30] sm:$0xff]  ;;  %v3209_v16 = vld [vmem:[%s7749_s1 + $0x58] sm:$0xff]  ;;  %v224_v33 = vrot.slane %v23_v10, 2 }
   0x5   :  { %5356 = vmatpush3.bf16.msra.mxu0 %v6341_v3  ;;  %v3210_v17 = vld [vmem:[%s7749_s1 + $0x60] sm:$0xff]  ;;  %v50_v18 = vrot.slane %v6371_v13, 1  ;;  %v33_v19 = vld [vmem:[%s7749_s1 + $0x38] sm:$0xff]  ;;  %v3211_v21 = vld [vmem:[%s7749_s1 + $0x68] sm:$0xff]  ;;  %v225_v34 = vrot.slane %v6371_v13, 2 }
   0x6   :  { %5358 = vmatprep.subr.bf16.mxu0 %v6346_v5  ;;  %5338 = vmatprep.subr.bf16.mxu1 %v6365_v11  ;;  %v6390_v20 = vpack.c.bf16 %v3210_v17, %v3209_v16  ;;  %v3212_v22 = vld [vmem:[%s7749_s1 + $0x70] sm:$0xff]  ;;  %v6405_v25 = vpack.c.bf16 %v33_v19, %v32_v15  ;;  %v3213_v26 = vld [vmem:[%s7749_s1 + $0x78] sm:$0xff]  ;;  %v3214_v27 = vld [vmem:[%s7749_s1 + $0x80] sm:$0xff] }
   0x7   :  { %5340 = vmatpush3.bf16.msra.mxu1 %v6365_v11  ;;  %v51_v23 = vsel %vm48_vm1, %v49_v12, %v50_v18  ;;  %v6402_v24 = vpack.c.bf16 %v3212_v22, %v3211_v21  ;;  %v6417_v28 = vpack.c.bf16 %v3214_v27, %v3213_v26  ;;  %v6423_v29 = vld [vmem:[%s7749_s1 + $0x40] sm:$0xff]  ;;  %v3220_v30 = vld [vmem:[%s7749_s1 + $0x90] sm:$0xff]  ;;  %v3221_v31 = vld [vmem:[%s7749_s1 + $0x98] sm:$0xff] }
   0x8   :  { %5342 = vmatprep.subr.bf16.mxu1 %v6390_v20  ;;  %4109 = vmatprep.mubr.msk.f32.mxu1 %vm54_vm0, %v51_v23  ;;  %v6434_v32 = vld [vmem:[%s7748_s0 + $0x10] sm:$0x3] }
   0x9   :  { %5360 = vmatpush3.bf16.msra.mxu0 %v6346_v5 }
   0xa   :  { %5362 = vmatprep.subr.bf16.mxu0 %v6374_v14 }
   0xb   :  { %5344 = vmatpush3.bf16.msra.mxu1 %v6390_v20 }
   0xc   :  { %5346 = vmatprep.subr.bf16.mxu1 %v6402_v24 }
   0xd   :  { %5364 = vmatpush3.bf16.msra.mxu0 %v6374_v14 }
   0xe   :  { %5366 = vmatprep.subr.bf16.mxu0 %v6405_v25 }
   0xf   :  { %5348 = vmatpush3.bf16.msra.mxu1 %v6402_v24 }
  0x10   :  { %10 = vsyncpa [#allocation3], 0  ;;  %v3222_v35 = vld [vmem:[%s7749_s1 + $0xa0] sm:$0xff]  ;;  %v3223_v36 = vld [vmem:[%s7749_s1 + $0xa8] sm:$0xff]  ;;  %5350 = vmatprep.subr.bf16.mxu1 %v6417_v28  ;;  %vm223_vm2 = vcmask 1045504   ;;  %v6447_v37 = vpack.c.bf16 %v3221_v31, %v3220_v30  ;;  %v52_v39 = vrot.slane %v6434_v32, 1 }
  0x11   :  { %5368 = vmatpush3.bf16.msra.mxu0 %v6405_v25  ;;  %v6452_v38 = vld [vmem:[%s7749_s1 + $0x88] sm:$0xff]  ;;  %v320_v40 = vld [vmem:[%s7751_s3] sm:$0xff]  ;;  %v6461_v42 = vpack.c.bf16 %v3223_v36, %v3222_v35  ;;  %v226_v43 = vsel %vm223_vm2, %v224_v33, %v225_v34  ;;  %v3224_v44 = vld [vmem:[%s7749_s1 + $0xb0] sm:$0xff]  ;;  %v6298_v53 = vmov 0.0|0.0   ;;  %v227_v0 = vrot.slane %v6434_v32, 2  ;;  %s6301_s21 = smov [#allocation2]  }
  0x12   :  { %4128 = vmatprep.subr.mxu0 %v6423_v29  ;;  %v321_v41 = vld [vmem:[%s7751_s3 + $0x8] sm:$0xff]  ;;  %v3225_v45 = vld [vmem:[%s7749_s1 + $0xb8] sm:$0xff]  ;;  %v53_v46 = vsel %vm48_vm1, %v50_v18, %v52_v39  ;;  %v322_v48 = vld [vmem:[%s7751_s3 + $0x10] sm:$0xff]  ;;  %vm6299_vm3 = vmmov 0   ;;  %s3199_s22 = sshll.u32 %s6301_s21, 4  ;;  %vm3189_vm4 = vcmask 1040384   ;;  %s3200_s22 = int_to_ptr.vmem [resolvable:$true] %s3199_s22 }
  0x13   :  { %5352 = vmatpush3.bf16.msra.mxu1 %v6417_v28  ;;  %v6479_v47 = vpack.c.bf16 %v321_v41, %v320_v40  ;;  %v323_v49 = vld [vmem:[%s7751_s3 + $0x18] sm:$0xff]  ;;  %v6490_v50 = vpack.c.bf16 %v3225_v45, %v3224_v44  ;;  %v3226_v51 = vld [vmem:[%s7749_s1 + $0xc0] sm:$0xff]  ;;  %v3227_v52 = vld [vmem:[%s7749_s1 + $0xc8] sm:$0xff]  ;;  %v228_v8 = vsel %vm223_vm2, %v225_v34, %v227_v0  ;;  %vm3191_vm5 = vcmask 74752   ;;  %s6274_s23 = scalar_lea.vmem %s3200_s22, 32  ;;  %p6279_p1 = scmp.lt.s32.totalorder %s3200_s22, %s3200_s22 }
  0x14   :  { %4107 = vmatprep.subr.mxu1 %v6452_v38  ;;  %v6502_v54 = vpack.c.bf16 %v323_v49, %v322_v48  ;;  %v324_v55 = vld [vmem:[%s7751_s3 + $0x20] sm:$0xff]  ;;  %v325_v56 = vld [vmem:[%s7751_s3 + $0x28] sm:$0xff]  ;;  %v6513_v57 = vpack.c.bf16 %v3227_v52, %v3226_v51  ;;  %v6518_v58 = vld [vmem:[%s7748_s0 + $0x18] sm:$0xff]  ;;  %p6275_p0 = scmp.ne.s32.totalorder %s3200_s22, %s6274_s23  ;;  %p6280_p2 = scmp.lt.s32.totalorder %s6274_s23, %s6274_s23 }
  0x15   :  { %4129 = vmatpush3.msra.mxu0 %v6423_v29  ;;  %v6521_v59 = vpack.c.bf16 %v325_v56, %v324_v55  ;;  %v6527_v60 = vld [vmem:[%s7748_s0 + $0x20] sm:$0xff]  ;;  %v326_v61 = vld [vmem:[%s7751_s3 + $0x30] sm:$0xff]  ;;  %v327_v62 = vld [vmem:[%s7751_s3 + $0x38] sm:$0xff]  ;;  %v1764_v1 = vrot.slane %v6518_v58, 1  ;;  %v1927_v18 = vrot.slane %v6518_v58, 2 }
  0x16   :  { %5370 = vmatprep.subr.bf16.mxu0 %v6447_v37  ;;  %4131 = vmatmul.mubr.msk.f32.vlgmr.msra.gmra.mrb[0].mxu0 %vm54_vm0, %v6371_v13  ;;  %v6540_v63 = vld [vmem:[%s7749_s1 + $0xd0] sm:$0xff]  ;;  %v1765_v2 = vrot.slane %v6527_v60, 1  ;;  %v6546_v4 = vpack.c.bf16 %v327_v62, %v326_v61  ;;  %v328_v6 = vld [vmem:[%s7751_s3 + $0x40] sm:$0xff]  ;;  %v329_v7 = vld [vmem:[%s7751_s3 + $0x48] sm:$0xff]  ;;  %v1928_v19 = vrot.slane %v6527_v60, 2  ;;  %p6281_p3 = por %p6280_p2, %p6279_p1 }
  0x17   :  { %5372 = vmatpush3.bf16.msra.mxu0 %v6447_v37  ;;  %4151 = vmatprep.mubr.msk.f32.mxu0 %vm54_vm0, %v226_v43  ;;  %v6562_v10 = vpack.c.bf16 %v329_v7, %v328_v6  ;;  %v330_v12 = vld [vmem:[%s7751_s3 + $0x50] sm:$0xff]  ;;  %v331_v13 = vld [vmem:[%s7751_s3 + $0x58] sm:$0xff]  ;;  %v333_v21 = vld [vmem:[%s7751_s3 + $0x68] sm:$0xff] }
  0x18   :  { %5374 = vmatprep.subr.bf16.mxu0 %v6461_v42  ;;  %4108 = vmatpush3.msra.mxu1 %v6452_v38  ;;  %v1766_v9 = vsel %vm48_vm1, %v1764_v1, %v1765_v2  ;;  %v6578_v15 = vpack.c.bf16 %v331_v13, %v330_v12  ;;  %v334_v23 = vld [vmem:[%s7751_s3 + $0x70] sm:$0xff]  ;;  %v3232_v26 = vld [vmem:[%s7751_s3 + $0x80] sm:$0xff]  ;;  %v3233_v27 = vld [vmem:[%s7751_s3 + $0x88] sm:$0xff]  ;;  %p6282_p4 = pnand %p6281_p3, %p6275_p0 }
  0x19   :  { %4110 = vmatmul.mubr.msk.f32.vlgmr.msra.gmra.mrb[0].mxu1 %vm54_vm0, %v53_v46  ;;  %5385 = vmatprep.subr.bf16.mxu1 %v6298_v53  ;;  %v3234_v30 = vld [vmem:[%s7751_s3 + $0x90] sm:$0xff]  ;;  %v3235_v31 = vld [vmem:[%s7751_s3 + $0x98] sm:$0xff]  ;;  %v3236_v33 = vld [vmem:[%s7751_s3 + $0xa0] sm:$0xff] }
  0x1a   :  { %5387 = vmatpush3.bf16.msra.mxu1 %v6479_v47  ;;  %v5413_v32 = vpack.c.bf16 %v3235_v31, %v3234_v30  ;;  %v3237_v34 = vld [vmem:[%s7751_s3 + $0xa8] sm:$0xff]  ;;  %v3238_v36 = vld [vmem:[%s7751_s3 + $0xb0] sm:$0xff]  ;;  %v3240_v39 = vld [vmem:[%s7751_s3 + $0xc0] sm:$0xff] }
  0x1b   :  { %5376 = vmatpush3.bf16.msra.mxu0 %v6461_v42  ;;  %5388 = vmatprep.subr.bf16.mxu1 %v6298_v53  ;;  %v5416_v35 = vpack.c.bf16 %v3237_v34, %v3236_v33  ;;  %v3241_v40 = vld [vmem:[%s7751_s3 + $0xc8] sm:$0xff]  ;;  %v3243_v43 = vld [vmem:[%s7751_s3 + $0xd8] sm:$0xff]  ;;  %v3244_v45 = vld [vmem:[%s7751_s3 + $0xe0] sm:$0xff] }
  0x1c   :  { %5378 = vmatprep.subr.bf16.mxu0 %v6490_v50  ;;  %v5422_v41 = vpack.c.bf16 %v3241_v40, %v3240_v39  ;;  %v3245_v46 = vld [vmem:[%s7751_s3 + $0xe8] sm:$0xff]  ;;  %v3246_v49 = vld [vmem:[%s7751_s3 + $0xf0] sm:$0xff]  ;;  %v3231_v56 = vld [vmem:[%s7750_s2] ss:$0 sm:$0xff] }
  0x1d   :  { %v5428_v48 = vpack.c.bf16 %v3245_v46, %v3244_v45  ;;  %v3248_v1 = vld [vmem:[%s7751_s3 + $0x100] sm:$0xff]  ;;  %v3265_v39 = vld [vmem:[%s7751_s3 + $0x188] sm:$0xff] }
  0x1e   :  { %5390 = vmatpush3.bf16.msra.mxu1 %v6502_v54  ;;  %v3252_v13 = vld [vmem:[%s7751_s3 + $0x120] sm:$0xff]  ;;  %v3269_v46 = vld [vmem:[%s7751_s3 + $0x1a8] sm:$0xff] }
  0x1f   :  { %5380 = vmatpush3.bf16.msra.mxu0 %v6490_v50  ;;  %5391 = vmatprep.subr.bf16.mxu1 %v6298_v53  ;;  %v3260_v31 = vld [vmem:[%s7751_s3 + $0x160] sm:$0xff] }
  0x20   :  { %5382 = vmatprep.subr.bf16.mxu0 %v6513_v57  ;;  %v3268_v45 = vld [vmem:[%s7751_s3 + $0x1a0] sm:$0xff] }
  0x22   :  { %5393 = vmatpush3.bf16.msra.mxu1 %v6521_v59 }
  0x23   :  { %5384 = vmatpush3.bf16.msra.mxu0 %v6513_v57  ;;  %5394 = vmatprep.subr.bf16.mxu1 %v6298_v53 }
  0x24   :  { %4149 = vmatprep.subr.mxu0 %v6540_v63 }
  0x26   :  { %5396 = vmatpush3.bf16.msra.mxu1 %v6546_v4 }
  0x27   :  { %4150 = vmatpush3.msra.mxu0 %v6540_v63  ;;  %5397 = vmatprep.subr.bf16.mxu1 %v6298_v53 }
  0x28   :  { %4152 = vmatmul.mubr.msk.f32.vlgmr.msra.gmra.mrb[0].mxu0 %vm54_vm0, %v228_v8  ;;  %5770 = vmatprep.subr.bf16.mxu0 %v6365_v11  ;;  %v3250_v8 = vld [vmem:[%s7751_s3 + $0x110] sm:$0xff] }
  0x29   :  { %5772 = vmatpush3.bf16.msra.mxu0 %v6365_v11  ;;  %4732 = vmatprep.mubr.msk.f32.mxu0 %vm54_vm0, %v1766_v9  ;;  %v3474_v11 = vld [vmem:[%s7748_s0 + $0x28] sm:$0x3]  ;;  %v3251_v9 = vld [vmem:[%s7751_s3 + $0x118] sm:$0xff] }
  0x2a   :  { %5774 = vmatprep.subr.bf16.mxu0 %v6390_v20  ;;  %5399 = vmatpush3.bf16.msra.mxu1 %v6562_v10  ;;  %v1767_v16 = vrot.slane %v3474_v11, 1  ;;  %v5437_v12 = vpack.c.bf16 %v3251_v9, %v3250_v8  ;;  %v3280_v9 = vld [vmem:[%s7751_s3 + $0x200] sm:$0xff] }
  0x2b   :  { %5400 = vmatprep.subr.bf16.mxu1 %v6298_v53 }
  0x2c   :  { %v1768_v17 = vsel %vm48_vm1, %v1765_v2, %v1767_v16  ;;  %v3249_v2 = vld [vmem:[%s7751_s3 + $0x108] sm:$0xff] }
  0x2d   :  { %5776 = vmatpush3.bf16.msra.mxu0 %v6390_v20  ;;  %v332_v20 = vld [vmem:[%s7751_s3 + $0x60] sm:$0xff]  ;;  %v5434_v6 = vpack.c.bf16 %v3249_v2, %v3248_v1 }
  0x2e   :  { %5778 = vmatprep.subr.bf16.mxu0 %v6402_v24  ;;  %5402 = vmatpush3.bf16.msra.mxu1 %v6578_v15  ;;  %v6632_v22 = vpack.c.bf16 %v333_v21, %v332_v20  ;;  %v3258_v21 = vld [vmem:[%s7751_s3 + $0x150] sm:$0xff] }
  0x2f   :  { %5403 = vmatprep.subr.bf16.mxu1 %v6298_v53 }
  0x31   :  { %5780 = vmatpush3.bf16.msra.mxu0 %v6402_v24  ;;  %v335_v24 = vld [vmem:[%s7751_s3 + $0x78] sm:$0xff] }
  0x32   :  { %5782 = vmatprep.subr.bf16.mxu0 %v6417_v28  ;;  %5405 = vmatpush3.bf16.msra.mxu1 %v6632_v22 }
  0x33   :  { %5406 = vmatprep.subr.bf16.mxu1 %v6298_v53 }
  0x35   :  { %5784 = vmatpush3.bf16.msra.mxu0 %v6417_v28  ;;  %v5410_v28 = vpack.c.bf16 %v3233_v27, %v3232_v26 }
  0x36   :  { %4730 = vmatprep.subr.mxu0 %v6452_v38 }
  0x39   :  { %4731 = vmatpush3.msra.mxu0 %v6452_v38 }
  0x3a   :  { %5786 = vmatprep.subr.bf16.mxu0 %v6341_v3  ;;  %4733 = vmatmul.mubr.msk.f32.vlgmr.msra.gmra.mrb[2].mxu0 %vm54_vm0, %v1768_v17  ;;  %v3254_v17 = vld [vmem:[%s7751_s3 + $0x130] sm:$0xff] }
  0x3b   :  { %5788 = vmatpush3.bf16.msra.mxu0 %v6341_v3  ;;  %4753 = vmatprep.mubr.msk.f32.mxu0 %vm54_vm0, %v6518_v58  ;;  %v1929_v3 = vsel %vm223_vm2, %v1927_v18, %v1928_v19  ;;  %v3255_v18 = vld [vmem:[%s7751_s3 + $0x138] sm:$0xff] }
  0x3c   :  { %5790 = vmatprep.subr.bf16.mxu0 %v6346_v5 }
  0x3f   :  { %5792 = vmatpush3.bf16.msra.mxu0 %v6346_v5  ;;  %v1930_v5 = vrot.slane %v3474_v11, 2  ;;  %v3253_v11 = vld [vmem:[%s7751_s3 + $0x128] sm:$0xff] }
  0x40   :  { %5794 = vmatprep.subr.bf16.mxu0 %v6374_v14  ;;  %v5440_v16 = vpack.c.bf16 %v3253_v11, %v3252_v13 }
  0x43   :  { %5796 = vmatpush3.bf16.msra.mxu0 %v6374_v14  ;;  %v1931_v14 = vsel %vm223_vm2, %v1928_v19, %v1930_v5  ;;  %v5443_v19 = vpack.c.bf16 %v3255_v18, %v3254_v17  ;;  %v3257_v5 = vld [vmem:[%s7751_s3 + $0x148] sm:$0xff]  ;;  %v3283_v17 = vld [vmem:[%s7751_s3 + $0x218] sm:$0xff] }
  0x44   :  { %5798 = vmatprep.subr.bf16.mxu0 %v6405_v25 }
  0x47   :  { %5800 = vmatpush3.bf16.msra.mxu0 %v6405_v25  ;;  %v6642_v25 = vpack.c.bf16 %v335_v24, %v334_v23  ;;  %v3259_v23 = vld [vmem:[%s7751_s3 + $0x158] sm:$0xff] }
  0x48   :  { %4751 = vmatprep.subr.mxu0 %v6423_v29 }
  0x49   :  { %5408 = vmatpush3.bf16.msra.mxu1 %v6642_v25 }
  0x4a   :  { %5409 = vmatprep.subr.bf16.mxu1 %v6298_v53 }
  0x4b   :  { %4752 = vmatpush3.msra.mxu0 %v6423_v29  ;;  %v6300_v29 = vmov 0.0  }
  0x4c   :  { %5802 = vmatprep.subr.bf16.mxu0 %v6447_v37  ;;  %4754 = vmatmul.mubr.msk.f32.vlgmr.msra.gmra.mrb[2].mxu0 %vm54_vm0, %v6527_v60 }
  0x4d   :  { %5804 = vmatpush3.bf16.msra.mxu0 %v6447_v37  ;;  %4774 = vmatprep.mubr.msk.f32.mxu0 %vm54_vm0, %v1929_v3  ;;  %v3239_v37 = vld [vmem:[%s7751_s3 + $0xb8] sm:$0xff]  ;;  %v3256_v3 = vld [vmem:[%s7751_s3 + $0x140] sm:$0xff] }
  0x4e   :  { %5806 = vmatprep.subr.bf16.mxu0 %v6461_v42  ;;  %4186 = vmatprep.mubr.msk.f32.mxu1 %vm6299_vm3, %v6300_v29  ;;  %v5419_v38 = vpack.c.bf16 %v3239_v37, %v3238_v36  ;;  %v3263_v36 = vld [vmem:[%s7751_s3 + $0x178] sm:$0xff] }
  0x51   :  { %5808 = vmatpush3.bf16.msra.mxu0 %v6461_v42  ;;  %v3242_v42 = vld [vmem:[%s7751_s3 + $0xd0] sm:$0xff] }
  0x52   :  { %5810 = vmatprep.subr.bf16.mxu0 %v6490_v50  ;;  %v5425_v44 = vpack.c.bf16 %v3243_v43, %v3242_v42  ;;  %v3266_v42 = vld [vmem:[%s7751_s3 + $0x190] sm:$0xff]  ;;  %v3267_v43 = vld [vmem:[%s7751_s3 + $0x198] sm:$0xff] }
  0x55   :  { %5812 = vmatpush3.bf16.msra.mxu0 %v6490_v50  ;;  %v3247_v50 = vld [vmem:[%s7751_s3 + $0xf8] sm:$0xff] }
  0x56   :  { %5814 = vmatprep.subr.bf16.mxu0 %v6513_v57  ;;  %v5431_v51 = vpack.c.bf16 %v3247_v50, %v3246_v49  ;;  %v3270_v49 = vld [vmem:[%s7751_s3 + $0x1b0] sm:$0xff]  ;;  %v3271_v50 = vld [vmem:[%s7751_s3 + $0x1b8] sm:$0xff] }
  0x59   :  { %5816 = vmatpush3.bf16.msra.mxu0 %v6513_v57 }
  0x5a   :  { %4772 = vmatprep.subr.mxu0 %v6540_v63 }
  0x5d   :  { %4773 = vmatpush3.msra.mxu0 %v6540_v63 }
  0x5e   :  { %4775 = vmatmul.mubr.msk.f32.vlgmr.msra.gmra.mrb[2].mxu0 %vm54_vm0, %v1931_v14  ;;  %5841 = vmatprep.subr.bf16.mxu0 %v6298_v53  ;;  %v5446_v14 = vpack.c.bf16 %v3257_v5, %v3256_v3  ;;  %v3285_v3 = vld [vmem:[%s7751_s3 + $0x228] sm:$0xff] }
  0x5f   :  { %4844 = vmatprep.mubr.msk.f32.mxu0 %vm6299_vm3, %v6300_v29  ;;  %5843 = vmatpush3.bf16.msra.mxu0 %v5410_v28 }
  0x60   :  { %5844 = vmatprep.subr.bf16.mxu0 %v6298_v53 }
  0x63   :  { %5846 = vmatpush3.bf16.msra.mxu0 %v5413_v32 }
  0x64   :  { %5847 = vmatprep.subr.bf16.mxu0 %v6298_v53 }
  0x67   :  { %5849 = vmatpush3.bf16.msra.mxu0 %v5416_v35 }
  0x68   :  { %5850 = vmatprep.subr.bf16.mxu0 %v6298_v53 }
  0x6b   :  { %5852 = vmatpush3.bf16.msra.mxu0 %v5419_v38 }
  0x6c   :  { %5853 = vmatprep.subr.bf16.mxu0 %v6298_v53 }
  0x6f   :  { %5855 = vmatpush3.bf16.msra.mxu0 %v5422_v41 }
  0x70   :  { %5856 = vmatprep.subr.bf16.mxu0 %v6298_v53 }
  0x73   :  { %5858 = vmatpush3.bf16.msra.mxu0 %v5425_v44 }
  0x74   :  { %5859 = vmatprep.subr.bf16.mxu0 %v6298_v53 }
  0x77   :  { %5861 = vmatpush3.bf16.msra.mxu0 %v5428_v48 }
  0x78   :  { %5862 = vmatprep.subr.bf16.mxu0 %v6298_v53 }
  0x7b   :  { %5864 = vmatpush3.bf16.msra.mxu0 %v5431_v51 }
  0x7c   :  { %5865 = vmatprep.subr.bf16.mxu0 %v6298_v53 }
  0xec   :  { %v4111_v52 = vpop.f32.mrb[0].mxu1 }
  0xed   :  { %v125_v55 = vpop.f32.mrb[1].mxu1 }
  0xfb   :  { %v4153_v57 = vpop.f32.mrb[0].mxu0 }
  0xfc   :  { %v6201_v58 = vadd.f32 %v4153_v57, %v4111_v52  ;;  %v299_v60 = vpop.f32.mrb[1].mxu0  ;;  %v3272_v52 = vld [vmem:[%s7751_s3 + $0x1c0] sm:$0xff]  ;;  %v3274_v57 = vld [vmem:[%s7751_s3 + $0x1d0] sm:$0xff] }
  0xfd   :  { %v6202_v61 = vadd.f32 %v299_v60, %v125_v55  ;;  %v3273_v55 = vld [vmem:[%s7751_s3 + $0x1c8] sm:$0xff] }
  0xfe   :  { %v6709_v62 = vadd.f32 %v6201_v58, %v3231_v56  ;;  %v3275_v58 = vld [vmem:[%s7751_s3 + $0x1d8] sm:$0xff] }
  0xff   :  { %v316_v63 = vadd.f32 %v6202_v61, %v3231_v56  ;;  %v5473_v60 = vpack.c.bf16 %v3275_v58, %v3274_v57  ;;  %v3276_v61 = vld [vmem:[%s7751_s3 + $0x1e0] sm:$0xff]  ;;  %v3305_v57 = vld [vmem:[%s7751_s3 + $0x2c8] sm:$0xff] }
 0x101   :  { %v6711_v0 = vmax.f32 %v316_v63, 0.0  ;;  %v3277_v63 = vld [vmem:[%s7751_s3 + $0x1e8] sm:$0xff] }
 0x102   :  { %v5476_v2 = vpack.c.bf16 %v3277_v63, %v3276_v61  ;;  %v3307_v61 = vld [vmem:[%s7751_s3 + $0x2d8] sm:$0xff] }
 0x103   :  { %4187 = vmatmul.mubr.f32.vlgmr.msra.gmra.mrb[2].mxu1 %v6711_v0  ;;  %v425_v7 = vrot.slane %v6711_v0, 1  ;;  %v605_v11 = vrot.slane %v6711_v0, 3 }
 0x104   :  { %5411 = vmatpush3.bf16.msra.mxu1 %v5410_v28  ;;  %4221 = vmatprep.mubr.msk.f32.mxu1 %vm6299_vm3, %v6300_v29  ;;  %v5449_v28 = vpack.c.bf16 %v3259_v23, %v3258_v21  ;;  %v3288_v23 = vld [vmem:[%s7751_s3 + $0x240] sm:$0xff] }
 0x105   :  { %5412 = vmatprep.subr.bf16.mxu1 %v6298_v53 }
 0x108   :  { %5414 = vmatpush3.bf16.msra.mxu1 %v5413_v32  ;;  %v3261_v32 = vld [vmem:[%s7751_s3 + $0x168] sm:$0xff] }
 0x109   :  { %5415 = vmatprep.subr.bf16.mxu1 %v6298_v53  ;;  %v5452_v34 = vpack.c.bf16 %v3261_v32, %v3260_v31  ;;  %v3291_v31 = vld [vmem:[%s7751_s3 + $0x258] sm:$0xff] }
 0x10c   :  { %5417 = vmatpush3.bf16.msra.mxu1 %v5416_v35  ;;  %v3262_v35 = vld [vmem:[%s7751_s3 + $0x170] sm:$0xff] }
 0x10d   :  { %5418 = vmatprep.subr.bf16.mxu1 %v6298_v53  ;;  %v5455_v37 = vpack.c.bf16 %v3263_v36, %v3262_v35 }
 0x110   :  { %5420 = vmatpush3.bf16.msra.mxu1 %v5419_v38  ;;  %v3264_v38 = vld [vmem:[%s7751_s3 + $0x180] sm:$0xff] }
 0x111   :  { %5421 = vmatprep.subr.bf16.mxu1 %v6298_v53  ;;  %v5458_v40 = vpack.c.bf16 %v3265_v39, %v3264_v38  ;;  %v3295_v38 = vld [vmem:[%s7751_s3 + $0x278] sm:$0xff] }
 0x114   :  { %5423 = vmatpush3.bf16.msra.mxu1 %v5422_v41  ;;  %v515_v41 = vrot.slane %v6711_v0, 2 }
 0x115   :  { %5424 = vmatprep.subr.bf16.mxu1 %v6298_v53 }
 0x118   :  { %5426 = vmatpush3.bf16.msra.mxu1 %v5425_v44  ;;  %v5461_v44 = vpack.c.bf16 %v3267_v43, %v3266_v42  ;;  %v695_v43 = vrot.slane %v6711_v0, 4 }
 0x119   :  { %5427 = vmatprep.subr.bf16.mxu1 %v6298_v53 }
 0x11c   :  { %5429 = vmatpush3.bf16.msra.mxu1 %v5428_v48  ;;  %v5464_v48 = vpack.c.bf16 %v3269_v46, %v3268_v45  ;;  %v3299_v45 = vld [vmem:[%s7751_s3 + $0x298] sm:$0xff] }
 0x11d   :  { %5430 = vmatprep.subr.bf16.mxu1 %v6298_v53 }
 0x120   :  { %5432 = vmatpush3.bf16.msra.mxu1 %v5431_v51  ;;  %v5467_v51 = vpack.c.bf16 %v3271_v50, %v3270_v49  ;;  %v3301_v49 = vld [vmem:[%s7751_s3 + $0x2a8] sm:$0xff] }
 0x121   :  { %5433 = vmatprep.subr.bf16.mxu1 %v6298_v53 }
 0x123   :  { %4222 = vmatmul.mubr.f32.vlgmr.msra.gmra.mrb[2].mxu1 %v425_v7  ;;  %v3279_v7 = vld [vmem:[%s7751_s3 + $0x1f8] sm:$0xff] }
 0x124   :  { %5435 = vmatpush3.bf16.msra.mxu1 %v5434_v6  ;;  %4256 = vmatprep.mubr.msk.f32.mxu1 %vm6299_vm3, %v6300_v29 }
 0x125   :  { %5436 = vmatprep.subr.bf16.mxu1 %v6298_v53 }
 0x128   :  { %5438 = vmatpush3.bf16.msra.mxu1 %v5437_v12 }
 0x129   :  { %5439 = vmatprep.subr.bf16.mxu1 %v6298_v53 }
 0x12c   :  { %5441 = vmatpush3.bf16.msra.mxu1 %v5440_v16 }
 0x12d   :  { %5442 = vmatprep.subr.bf16.mxu1 %v6298_v53 }
 0x130   :  { %5444 = vmatpush3.bf16.msra.mxu1 %v5443_v19 }
 0x131   :  { %v4776_v20 = vpop.f32.mrb[2].mxu0  ;;  %5445 = vmatprep.subr.bf16.mxu1 %v6298_v53 }
 0x132   :  { %v6767_v24 = vadd.f32 %v4776_v20, %v3231_v56  ;;  %v2002_v26 = vpop.f32.mrb[3].mxu0  ;;  %v3287_v20 = vld [vmem:[%s7751_s3 + $0x238] sm:$0xff] }
 0x133   :  { %v2013_v27 = vadd.f32 %v3231_v56, %v2002_v26  ;;  %v5470_v56 = vpack.c.bf16 %v3273_v55, %v3272_v52  ;;  %v3289_v26 = vld [vmem:[%s7751_s3 + $0x248] sm:$0xff]  ;;  %v3303_v52 = vld [vmem:[%s7751_s3 + $0x2b8] sm:$0xff] }
 0x134   :  { %5447 = vmatpush3.bf16.msra.mxu1 %v5446_v14 }
 0x135   :  { %v6769_v30 = vmax.f32 %v2013_v27, 0.0  ;;  %5448 = vmatprep.subr.bf16.mxu1 %v6298_v53  ;;  %v5494_v27 = vpack.c.bf16 %v3289_v26, %v3288_v23  ;;  %v3319_v23 = vld [vmem:[%s7751_s3 + $0x338] sm:$0xff] }
 0x137   :  { %v2089_v33 = vrot.slane %v6769_v30, 1  ;;  %v2162_v1 = vrot.slane %v6769_v30, 2  ;;  %v2235_v35 = vrot.slane %v6769_v30, 3 }
 0x138   :  { %5450 = vmatpush3.bf16.msra.mxu1 %v5449_v28 }
 0x139   :  { %4845 = vmatmul.mubr.f32.vlgmr.msra.gmra.mrb[4].mxu0 %v2089_v33  ;;  %5451 = vmatprep.subr.bf16.mxu1 %v6298_v53  ;;  %v3292_v33 = vld [vmem:[%s7751_s3 + $0x260] sm:$0xff] }
 0x13a   :  { %5867 = vmatpush3.bf16.msra.mxu0 %v5434_v6  ;;  %4879 = vmatprep.mubr.msk.f32.mxu0 %vm6299_vm3, %v6300_v29  ;;  %v3278_v6 = vld [vmem:[%s7751_s3 + $0x1f0] sm:$0xff] }
 0x13b   :  { %5868 = vmatprep.subr.bf16.mxu0 %v6298_v53  ;;  %v5479_v8 = vpack.c.bf16 %v3279_v7, %v3278_v6  ;;  %v2308_v6 = vrot.slane %v6769_v30, 4 }
 0x13c   :  { %5453 = vmatpush3.bf16.msra.mxu1 %v5452_v34 }
 0x13d   :  { %5454 = vmatprep.subr.bf16.mxu1 %v6298_v53 }
 0x13e   :  { %5870 = vmatpush3.bf16.msra.mxu0 %v5437_v12  ;;  %v3281_v12 = vld [vmem:[%s7751_s3 + $0x208] sm:$0xff] }
 0x13f   :  { %5871 = vmatprep.subr.bf16.mxu0 %v6298_v53  ;;  %v5482_v13 = vpack.c.bf16 %v3281_v12, %v3280_v9  ;;  %v3311_v9 = vld [vmem:[%s7751_s3 + $0x2f8] sm:$0xff] }
 0x140   :  { %5456 = vmatpush3.bf16.msra.mxu1 %v5455_v37 }
 0x141   :  { %5457 = vmatprep.subr.bf16.mxu1 %v6298_v53 }
 0x142   :  { %5873 = vmatpush3.bf16.msra.mxu0 %v5440_v16  ;;  %v3282_v16 = vld [vmem:[%s7751_s3 + $0x210] sm:$0xff] }
 0x143   :  { %4257 = vmatmul.mubr.f32.vlgmr.msra.gmra.mrb[2].mxu1 %v515_v41  ;;  %5874 = vmatprep.subr.bf16.mxu0 %v6298_v53  ;;  %v5485_v18 = vpack.c.bf16 %v3283_v17, %v3282_v16  ;;  %v3297_v41 = vld [vmem:[%s7751_s3 + $0x288] sm:$0xff]  ;;  %v785_v17 = vrot.slane %v6711_v0, 5 }
 0x144   :  { %5459 = vmatpush3.bf16.msra.mxu1 %v5458_v40  ;;  %4291 = vmatprep.mubr.msk.f32.mxu1 %vm6299_vm3, %v6300_v29 }
 0x145   :  { %5460 = vmatprep.subr.bf16.mxu1 %v6298_v53 }
 0x146   :  { %5876 = vmatpush3.bf16.msra.mxu0 %v5443_v19  ;;  %v3284_v19 = vld [vmem:[%s7751_s3 + $0x220] sm:$0xff] }
 0x147   :  { %5877 = vmatprep.subr.bf16.mxu0 %v6298_v53  ;;  %v5488_v5 = vpack.c.bf16 %v3285_v3, %v3284_v19  ;;  %v3315_v19 = vld [vmem:[%s7751_s3 + $0x318] sm:$0xff] }
 0x148   :  { %5462 = vmatpush3.bf16.msra.mxu1 %v5461_v44 }
 0x149   :  { %5463 = vmatprep.subr.bf16.mxu1 %v6298_v53 }
 0x14a   :  { %5879 = vmatpush3.bf16.msra.mxu0 %v5446_v14  ;;  %v3286_v14 = vld [vmem:[%s7751_s3 + $0x230] sm:$0xff] }
 0x14b   :  { %5880 = vmatprep.subr.bf16.mxu0 %v6298_v53  ;;  %v5491_v21 = vpack.c.bf16 %v3287_v20, %v3286_v14  ;;  %v3317_v14 = vld [vmem:[%s7751_s3 + $0x328] sm:$0xff] }
 0x14c   :  { %5465 = vmatpush3.bf16.msra.mxu1 %v5464_v48 }
 0x14d   :  { %5466 = vmatprep.subr.bf16.mxu1 %v6298_v53 }
 0x14e   :  { %5882 = vmatpush3.bf16.msra.mxu0 %v5449_v28  ;;  %v3290_v28 = vld [vmem:[%s7751_s3 + $0x250] sm:$0xff] }
 0x14f   :  { %5883 = vmatprep.subr.bf16.mxu0 %v6298_v53  ;;  %v5497_v32 = vpack.c.bf16 %v3291_v31, %v3290_v28  ;;  %v3321_v28 = vld [vmem:[%s7751_s3 + $0x348] sm:$0xff] }
 0x150   :  { %5468 = vmatpush3.bf16.msra.mxu1 %v5467_v51 }
 0x151   :  { %5469 = vmatprep.subr.bf16.mxu1 %v6298_v53 }
 0x152   :  { %5885 = vmatpush3.bf16.msra.mxu0 %v5452_v34  ;;  %v3293_v34 = vld [vmem:[%s7751_s3 + $0x268] sm:$0xff] }
 0x153   :  { %5886 = vmatprep.subr.bf16.mxu0 %v6298_v53  ;;  %v5500_v36 = vpack.c.bf16 %v3293_v34, %v3292_v33  ;;  %v3323_v33 = vld [vmem:[%s7751_s3 + $0x358] sm:$0xff] }
 0x154   :  { %5471 = vmatpush3.bf16.msra.mxu1 %v5470_v56 }
 0x155   :  { %5472 = vmatprep.subr.bf16.mxu1 %v6298_v53 }
 0x156   :  { %5888 = vmatpush3.bf16.msra.mxu0 %v5455_v37  ;;  %v3294_v37 = vld [vmem:[%s7751_s3 + $0x270] sm:$0xff] }
 0x157   :  { %5889 = vmatprep.subr.bf16.mxu0 %v6298_v53  ;;  %v5503_v39 = vpack.c.bf16 %v3295_v38, %v3294_v37  ;;  %v2381_v37 = vrot.slane %v6769_v30, 5 }
 0x158   :  { %5474 = vmatpush3.bf16.msra.mxu1 %v5473_v60 }
 0x159   :  { %4880 = vmatmul.mubr.f32.vlgmr.msra.gmra.mrb[4].mxu0 %v2162_v1  ;;  %5475 = vmatprep.subr.bf16.mxu1 %v6298_v53  ;;  %v3308_v1 = vld [vmem:[%s7751_s3 + $0x2e0] sm:$0xff] }
 0x15a   :  { %5891 = vmatpush3.bf16.msra.mxu0 %v5458_v40  ;;  %4914 = vmatprep.mubr.msk.f32.mxu0 %vm6299_vm3, %v6300_v29  ;;  %v3296_v40 = vld [vmem:[%s7751_s3 + $0x280] sm:$0xff] }
 0x15b   :  { %5892 = vmatprep.subr.bf16.mxu0 %v6298_v53  ;;  %v5506_v42 = vpack.c.bf16 %v3297_v41, %v3296_v40  ;;  %v3327_v40 = vld [vmem:[%s7751_s3 + $0x378] sm:$0xff] }
 0x15c   :  { %5477 = vmatpush3.bf16.msra.mxu1 %v5476_v2 }
 0x15d   :  { %5478 = vmatprep.subr.bf16.mxu1 %v6298_v53 }
 0x15e   :  { %5894 = vmatpush3.bf16.msra.mxu0 %v5461_v44  ;;  %v3298_v44 = vld [vmem:[%s7751_s3 + $0x290] sm:$0xff] }
 0x15f   :  { %5895 = vmatprep.subr.bf16.mxu0 %v6298_v53  ;;  %v5509_v46 = vpack.c.bf16 %v3299_v45, %v3298_v44  ;;  %v875_v45 = vrot.slane %v6711_v0, 6 }
 0x160   :  { %5480 = vmatpush3.bf16.msra.mxu1 %v5479_v8 }
 0x161   :  { %5481 = vmatprep.subr.bf16.mxu1 %v6298_v53 }
 0x162   :  { %5897 = vmatpush3.bf16.msra.mxu0 %v5464_v48  ;;  %v3300_v48 = vld [vmem:[%s7751_s3 + $0x2a0] sm:$0xff] }
 0x163   :  { %4292 = vmatmul.mubr.f32.vlgmr.msra.gmra.mrb[2].mxu1 %v605_v11  ;;  %5898 = vmatprep.subr.bf16.mxu0 %v6298_v53  ;;  %v5512_v50 = vpack.c.bf16 %v3301_v49, %v3300_v48  ;;  %v3313_v11 = vld [vmem:[%s7751_s3 + $0x308] sm:$0xff]  ;;  %v3331_v48 = vld [vmem:[%s7751_s3 + $0x398] sm:$0xff] }
 0x164   :  { %5483 = vmatpush3.bf16.msra.mxu1 %v5482_v13  ;;  %4326 = vmatprep.mubr.msk.f32.mxu1 %vm6299_vm3, %v6300_v29 }
 0x165   :  { %5484 = vmatprep.subr.bf16.mxu1 %v6298_v53 }
 0x166   :  { %5900 = vmatpush3.bf16.msra.mxu0 %v5467_v51  ;;  %v3302_v51 = vld [vmem:[%s7751_s3 + $0x2b0] sm:$0xff] }
 0x167   :  { %5901 = vmatprep.subr.bf16.mxu0 %v6298_v53  ;;  %v5515_v55 = vpack.c.bf16 %v3303_v52, %v3302_v51  ;;  %v3333_v51 = vld [vmem:[%s7751_s3 + $0x3a8] sm:$0xff] }
 0x168   :  { %5486 = vmatpush3.bf16.msra.mxu1 %v5485_v18 }
 0x169   :  { %5487 = vmatprep.subr.bf16.mxu1 %v6298_v53 }
 0x16a   :  { %5903 = vmatpush3.bf16.msra.mxu0 %v5470_v56  ;;  %v3304_v56 = vld [vmem:[%s7751_s3 + $0x2c0] sm:$0xff] }
 0x16b   :  { %5904 = vmatprep.subr.bf16.mxu0 %v6298_v53  ;;  %v5518_v58 = vpack.c.bf16 %v3305_v57, %v3304_v56  ;;  %v3335_v56 = vld [vmem:[%s7751_s3 + $0x3b8] sm:$0xff] }
 0x16c   :  { %5489 = vmatpush3.bf16.msra.mxu1 %v5488_v5 }
 0x16d   :  { %5490 = vmatprep.subr.bf16.mxu1 %v6298_v53 }
 0x16e   :  { %5906 = vmatpush3.bf16.msra.mxu0 %v5473_v60  ;;  %v3306_v60 = vld [vmem:[%s7751_s3 + $0x2d0] sm:$0xff] }
 0x16f   :  { %5907 = vmatprep.subr.bf16.mxu0 %v6298_v53  ;;  %v5521_v63 = vpack.c.bf16 %v3307_v61, %v3306_v60  ;;  %v3337_v60 = vld [vmem:[%s7751_s3 + $0x3c8] sm:$0xff] }
 0x170   :  { %5492 = vmatpush3.bf16.msra.mxu1 %v5491_v21 }
 0x171   :  { %5493 = vmatprep.subr.bf16.mxu1 %v6298_v53 }
 0x172   :  { %5909 = vmatpush3.bf16.msra.mxu0 %v5476_v2  ;;  %v3309_v2 = vld [vmem:[%s7751_s3 + $0x2e8] sm:$0xff] }
 0x173   :  { %5910 = vmatprep.subr.bf16.mxu0 %v6298_v53  ;;  %v5524_v7 = vpack.c.bf16 %v3309_v2, %v3308_v1  ;;  %v3339_v1 = vld [vmem:[%s7751_s3 + $0x3d8] sm:$0xff] }
 0x174   :  { %5495 = vmatpush3.bf16.msra.mxu1 %v5494_v27 }
 0x175   :  { %5496 = vmatprep.subr.bf16.mxu1 %v6298_v53 }
 0x176   :  { %5912 = vmatpush3.bf16.msra.mxu0 %v5479_v8  ;;  %v3310_v8 = vld [vmem:[%s7751_s3 + $0x2f0] sm:$0xff] }
 0x177   :  { %5913 = vmatprep.subr.bf16.mxu0 %v6298_v53  ;;  %v5527_v12 = vpack.c.bf16 %v3311_v9, %v3310_v8  ;;  %v2454_v8 = vrot.slane %v6769_v30, 6 }
 0x178   :  { %5498 = vmatpush3.bf16.msra.mxu1 %v5497_v32 }
 0x179   :  { %4915 = vmatmul.mubr.f32.vlgmr.msra.gmra.mrb[4].mxu0 %v2235_v35  ;;  %5499 = vmatprep.subr.bf16.mxu1 %v6298_v53  ;;  %v3324_v35 = vld [vmem:[%s7751_s3 + $0x360] sm:$0xff] }
 0x17a   :  { %5915 = vmatpush3.bf16.msra.mxu0 %v5482_v13  ;;  %4949 = vmatprep.mubr.msk.f32.mxu0 %vm6299_vm3, %v6300_v29  ;;  %v3312_v13 = vld [vmem:[%s7751_s3 + $0x300] sm:$0xff] }
 0x17b   :  { %5916 = vmatprep.subr.bf16.mxu0 %v6298_v53  ;;  %v5530_v16 = vpack.c.bf16 %v3313_v11, %v3312_v13  ;;  %v3343_v13 = vld [vmem:[%s7751_s3 + $0x3f8] sm:$0xff] }
 0x17c   :  { %5501 = vmatpush3.bf16.msra.mxu1 %v5500_v36 }
 0x17d   :  { %5502 = vmatprep.subr.bf16.mxu1 %v6298_v53 }
 0x17e   :  { %5918 = vmatpush3.bf16.msra.mxu0 %v5485_v18  ;;  %v3314_v18 = vld [vmem:[%s7751_s3 + $0x310] sm:$0xff] }
 0x17f   :  { %5919 = vmatprep.subr.bf16.mxu0 %v6298_v53  ;;  %v5533_v3 = vpack.c.bf16 %v3315_v19, %v3314_v18  ;;  %v965_v19 = vrot.slane %v6711_v0, 7  ;;  %v3348_v0 = vld [vmem:[%s7751_s3 + $0x420] sm:$0xff] }
 0x180   :  { %5504 = vmatpush3.bf16.msra.mxu1 %v5503_v39 }
 0x181   :  { %5505 = vmatprep.subr.bf16.mxu1 %v6298_v53 }
 0x182   :  { %5921 = vmatpush3.bf16.msra.mxu0 %v5488_v5  ;;  %v3316_v5 = vld [vmem:[%s7751_s3 + $0x320] sm:$0xff] }
 0x183   :  { %4327 = vmatmul.mubr.f32.vlgmr.msra.gmra.mrb[2].mxu1 %v695_v43  ;;  %5922 = vmatprep.subr.bf16.mxu0 %v6298_v53  ;;  %v5536_v20 = vpack.c.bf16 %v3317_v14, %v3316_v5  ;;  %v3329_v43 = vld [vmem:[%s7751_s3 + $0x388] sm:$0xff]  ;;  %v3347_v5 = vld [vmem:[%s7751_s3 + $0x418] sm:$0xff] }
 0x184   :  { %5507 = vmatpush3.bf16.msra.mxu1 %v5506_v42  ;;  %4361 = vmatprep.mubr.msk.f32.mxu1 %vm6299_vm3, %v6300_v29 }
 0x185   :  { %5508 = vmatprep.subr.bf16.mxu1 %v6298_v53 }
 0x186   :  { %5924 = vmatpush3.bf16.msra.mxu0 %v5491_v21  ;;  %v3318_v21 = vld [vmem:[%s7751_s3 + $0x330] sm:$0xff] }
 0x187   :  { %5925 = vmatprep.subr.bf16.mxu0 %v6298_v53  ;;  %v5539_v26 = vpack.c.bf16 %v3319_v23, %v3318_v21  ;;  %v3350_v23 = vld [vmem:[%s7751_s3 + $0x430] sm:$0xff] }
 0x188   :  { %5510 = vmatpush3.bf16.msra.mxu1 %v5509_v46 }
 0x189   :  { %5511 = vmatprep.subr.bf16.mxu1 %v6298_v53 }
 0x18a   :  { %5927 = vmatpush3.bf16.msra.mxu0 %v5494_v27  ;;  %v3320_v27 = vld [vmem:[%s7751_s3 + $0x340] sm:$0xff] }
 0x18b   :  { %5928 = vmatprep.subr.bf16.mxu0 %v6298_v53  ;;  %v5542_v31 = vpack.c.bf16 %v3321_v28, %v3320_v27  ;;  %v3352_v28 = vld [vmem:[%s7751_s3 + $0x440] sm:$0xff] }
 0x18c   :  { %5513 = vmatpush3.bf16.msra.mxu1 %v5512_v50 }
 0x18d   :  { %5514 = vmatprep.subr.bf16.mxu1 %v6298_v53 }
 0x18e   :  { %5930 = vmatpush3.bf16.msra.mxu0 %v5497_v32  ;;  %v3322_v32 = vld [vmem:[%s7751_s3 + $0x350] sm:$0xff] }
 0x18f   :  { %5931 = vmatprep.subr.bf16.mxu0 %v6298_v53  ;;  %v5545_v34 = vpack.c.bf16 %v3323_v33, %v3322_v32  ;;  %v3354_v33 = vld [vmem:[%s7751_s3 + $0x450] sm:$0xff] }
 0x190   :  { %5516 = vmatpush3.bf16.msra.mxu1 %v5515_v55 }
 0x191   :  { %5517 = vmatprep.subr.bf16.mxu1 %v6298_v53 }
 0x192   :  { %5933 = vmatpush3.bf16.msra.mxu0 %v5500_v36  ;;  %v3325_v36 = vld [vmem:[%s7751_s3 + $0x368] sm:$0xff] }
 0x193   :  { %5934 = vmatprep.subr.bf16.mxu0 %v6298_v53  ;;  %v5548_v38 = vpack.c.bf16 %v3325_v36, %v3324_v35  ;;  %v3356_v36 = vld [vmem:[%s7751_s3 + $0x460] sm:$0xff] }
 0x194   :  { %5519 = vmatpush3.bf16.msra.mxu1 %v5518_v58 }
 0x195   :  { %5520 = vmatprep.subr.bf16.mxu1 %v6298_v53 }
 0x196   :  { %5936 = vmatpush3.bf16.msra.mxu0 %v5503_v39  ;;  %v3326_v39 = vld [vmem:[%s7751_s3 + $0x370] sm:$0xff] }
 0x197   :  { %5937 = vmatprep.subr.bf16.mxu0 %v6298_v53  ;;  %v5551_v41 = vpack.c.bf16 %v3327_v40, %v3326_v39  ;;  %v3358_v40 = vld [vmem:[%s7751_s3 + $0x470] sm:$0xff] }
 0x198   :  { %5522 = vmatpush3.bf16.msra.mxu1 %v5521_v63 }
 0x199   :  { %4950 = vmatmul.mubr.f32.vlgmr.msra.gmra.mrb[4].mxu0 %v2308_v6  ;;  %5523 = vmatprep.subr.bf16.mxu1 %v6298_v53  ;;  %v3340_v6 = vld [vmem:[%s7751_s3 + $0x3e0] sm:$0xff] }
 0x19a   :  { %5939 = vmatpush3.bf16.msra.mxu0 %v5506_v42  ;;  %4984 = vmatprep.mubr.msk.f32.mxu0 %vm6299_vm3, %v6300_v29  ;;  %v3328_v42 = vld [vmem:[%s7751_s3 + $0x380] sm:$0xff] }
 0x19b   :  { %5940 = vmatprep.subr.bf16.mxu0 %v6298_v53  ;;  %v5554_v44 = vpack.c.bf16 %v3329_v43, %v3328_v42  ;;  %v3360_v43 = vld [vmem:[%s7751_s3 + $0x480] sm:$0xff] }
 0x19c   :  { %5525 = vmatpush3.bf16.msra.mxu1 %v5524_v7 }
 0x19d   :  { %5526 = vmatprep.subr.bf16.mxu1 %v6298_v53 }
 0x19e   :  { %5942 = vmatpush3.bf16.msra.mxu0 %v5509_v46  ;;  %v3330_v46 = vld [vmem:[%s7751_s3 + $0x390] sm:$0xff] }
 0x19f   :  { %5943 = vmatprep.subr.bf16.mxu0 %v6298_v53  ;;  %v5557_v49 = vpack.c.bf16 %v3331_v48, %v3330_v46  ;;  %v7218_v46 = vmax.f32 %v6709_v62, 0.0  ;;  %v3362_v48 = vld [vmem:[%s7751_s3 + $0x490] sm:$0xff]  ;;  %v3364_v62 = vld [vmem:[%s7751_s3 + $0x4a0] sm:$0xff] }
 0x1a0   :  { %5528 = vmatpush3.bf16.msra.mxu1 %v5527_v12 }
 0x1a1   :  { %5529 = vmatprep.subr.bf16.mxu1 %v6298_v53 }
 0x1a2   :  { %5945 = vmatpush3.bf16.msra.mxu0 %v5512_v50  ;;  %v3332_v50 = vld [vmem:[%s7751_s3 + $0x3a0] sm:$0xff] }
 0x1a3   :  { %4362 = vmatmul.mubr.f32.vlgmr.msra.gmra.mrb[2].mxu1 %v785_v17  ;;  %5946 = vmatprep.subr.bf16.mxu0 %v6298_v53  ;;  %v5560_v52 = vpack.c.bf16 %v3333_v51, %v3332_v50  ;;  %v3345_v17 = vld [vmem:[%s7751_s3 + $0x408] sm:$0xff] }
 0x1a4   :  { %5531 = vmatpush3.bf16.msra.mxu1 %v5530_v16  ;;  %4396 = vmatprep.mubr.msk.f32.mxu1 %vm6299_vm3, %v6300_v29  ;;  %v3365_v51 = vld [vmem:[%s7751_s3 + $0x4a8] sm:$0xff] }
 0x1a5   :  { %5532 = vmatprep.subr.bf16.mxu1 %v6298_v53 }
 0x1a6   :  { %5948 = vmatpush3.bf16.msra.mxu0 %v5515_v55  ;;  %v3334_v55 = vld [vmem:[%s7751_s3 + $0x3b0] sm:$0xff] }
 0x1a7   :  { %5949 = vmatprep.subr.bf16.mxu0 %v6298_v53  ;;  %v5563_v57 = vpack.c.bf16 %v3335_v56, %v3334_v55  ;;  %v3366_v55 = vld [vmem:[%s7751_s3 + $0x4b0] sm:$0xff]  ;;  %v3367_v56 = vld [vmem:[%s7751_s3 + $0x4b8] sm:$0xff] }
 0x1a8   :  { %5534 = vmatpush3.bf16.msra.mxu1 %v5533_v3 }
 0x1a9   :  { %5535 = vmatprep.subr.bf16.mxu1 %v6298_v53 }
 0x1aa   :  { %5951 = vmatpush3.bf16.msra.mxu0 %v5518_v58  ;;  %v3336_v58 = vld [vmem:[%s7751_s3 + $0x3c0] sm:$0xff] }
 0x1ab   :  { %5952 = vmatprep.subr.bf16.mxu0 %v6298_v53  ;;  %v5566_v61 = vpack.c.bf16 %v3337_v60, %v3336_v58  ;;  %v3368_v58 = vld [vmem:[%s7751_s3 + $0x4c0] sm:$0xff]  ;;  %v3369_v60 = vld [vmem:[%s7751_s3 + $0x4c8] sm:$0xff] }
 0x1ac   :  { %5537 = vmatpush3.bf16.msra.mxu1 %v5536_v20 }
 0x1ad   :  { %5538 = vmatprep.subr.bf16.mxu1 %v6298_v53 }
 0x1ae   :  { %5954 = vmatpush3.bf16.msra.mxu0 %v5521_v63  ;;  %v3338_v63 = vld [vmem:[%s7751_s3 + $0x3d0] sm:$0xff] }
 0x1af   :  { %5955 = vmatprep.subr.bf16.mxu0 %v6298_v53  ;;  %v5569_v2 = vpack.c.bf16 %v3339_v1, %v3338_v63  ;;  %v3370_v63 = vld [vmem:[%s7751_s3 + $0x4d0] sm:$0xff]  ;;  %v3371_v1 = vld [vmem:[%s7751_s3 + $0x4d8] sm:$0xff] }
 0x1b0   :  { %5540 = vmatpush3.bf16.msra.mxu1 %v5539_v26 }
 0x1b1   :  { %5541 = vmatprep.subr.bf16.mxu1 %v6298_v53 }
 0x1b2   :  { %5957 = vmatpush3.bf16.msra.mxu0 %v5524_v7  ;;  %v3341_v7 = vld [vmem:[%s7751_s3 + $0x3e8] sm:$0xff] }
 0x1b3   :  { %5958 = vmatprep.subr.bf16.mxu0 %v6298_v53  ;;  %v5572_v9 = vpack.c.bf16 %v3341_v7, %v3340_v6  ;;  %v3372_v6 = vld [vmem:[%s7751_s3 + $0x4e0] sm:$0xff]  ;;  %v3373_v7 = vld [vmem:[%s7751_s3 + $0x4e8] sm:$0xff] }
 0x1b4   :  { %5543 = vmatpush3.bf16.msra.mxu1 %v5542_v31 }
 0x1b5   :  { %5544 = vmatprep.subr.bf16.mxu1 %v6298_v53 }
 0x1b6   :  { %5960 = vmatpush3.bf16.msra.mxu0 %v5527_v12  ;;  %v3342_v12 = vld [vmem:[%s7751_s3 + $0x3f0] sm:$0xff] }
 0x1b7   :  { %5961 = vmatprep.subr.bf16.mxu0 %v6298_v53  ;;  %v5575_v11 = vpack.c.bf16 %v3343_v13, %v3342_v12  ;;  %v3374_v12 = vld [vmem:[%s7751_s3 + $0x4f0] sm:$0xff]  ;;  %v3375_v13 = vld [vmem:[%s7751_s3 + $0x4f8] sm:$0xff] }
 0x1b8   :  { %5546 = vmatpush3.bf16.msra.mxu1 %v5545_v34 }
 0x1b9   :  { %4985 = vmatmul.mubr.f32.vlgmr.msra.gmra.mrb[4].mxu0 %v2381_v37  ;;  %5547 = vmatprep.subr.bf16.mxu1 %v6298_v53  ;;  %v3357_v37 = vld [vmem:[%s7751_s3 + $0x468] sm:$0xff] }
 0x1ba   :  { %5963 = vmatpush3.bf16.msra.mxu0 %v5530_v16  ;;  %5019 = vmatprep.mubr.msk.f32.mxu0 %vm6299_vm3, %v6300_v29  ;;  %v3344_v16 = vld [vmem:[%s7751_s3 + $0x400] sm:$0xff]  ;;  %v5596_v39 = vpack.c.bf16 %v3357_v37, %v3356_v36  ;;  %v3389_v36 = vld [vmem:[%s7751_s3 + $0x568] sm:$0xff] }
 0x1bb   :  { %5964 = vmatprep.subr.bf16.mxu0 %v6298_v53  ;;  %v5578_v18 = vpack.c.bf16 %v3345_v17, %v3344_v16  ;;  %v3377_v16 = vld [vmem:[%s7751_s3 + $0x508] sm:$0xff] }
 0x1bc   :  { %5549 = vmatpush3.bf16.msra.mxu1 %v5548_v38 }
 0x1bd   :  { %5550 = vmatprep.subr.bf16.mxu1 %v6298_v53 }
 0x1be   :  { %5966 = vmatpush3.bf16.msra.mxu0 %v5533_v3  ;;  %v3346_v3 = vld [vmem:[%s7751_s3 + $0x410] sm:$0xff] }
 0x1bf   :  { %5967 = vmatprep.subr.bf16.mxu0 %v6298_v53  ;;  %v5581_v14 = vpack.c.bf16 %v3347_v5, %v3346_v3  ;;  %v3379_v3 = vld [vmem:[%s7751_s3 + $0x518] sm:$0xff] }
 0x1c0   :  { %5552 = vmatpush3.bf16.msra.mxu1 %v5551_v41 }
 0x1c1   :  { %5553 = vmatprep.subr.bf16.mxu1 %v6298_v53 }
 0x1c2   :  { %5969 = vmatpush3.bf16.msra.mxu0 %v5536_v20  ;;  %v3349_v20 = vld [vmem:[%s7751_s3 + $0x428] sm:$0xff] }
 0x1c3   :  { %4397 = vmatmul.mubr.f32.vlgmr.msra.gmra.mrb[2].mxu1 %v875_v45  ;;  %5970 = vmatprep.subr.bf16.mxu0 %v6298_v53  ;;  %v5584_v21 = vpack.c.bf16 %v3349_v20, %v3348_v0  ;;  %v3381_v0 = vld [vmem:[%s7751_s3 + $0x528] sm:$0xff] }
 0x1c4   :  { %5555 = vmatpush3.bf16.msra.mxu1 %v5554_v44  ;;  %4431 = vmatprep.mubr.msk.f32.mxu1 %vm6299_vm3, %v6300_v29 }
 0x1c5   :  { %5556 = vmatprep.subr.bf16.mxu1 %v6298_v53 }
 0x1c6   :  { %5972 = vmatpush3.bf16.msra.mxu0 %v5539_v26  ;;  %v3351_v26 = vld [vmem:[%s7751_s3 + $0x438] sm:$0xff] }
 0x1c7   :  { %5973 = vmatprep.subr.bf16.mxu0 %v6298_v53  ;;  %v5587_v27 = vpack.c.bf16 %v3351_v26, %v3350_v23  ;;  %v3383_v23 = vld [vmem:[%s7751_s3 + $0x538] sm:$0xff] }
 0x1c8   :  { %5558 = vmatpush3.bf16.msra.mxu1 %v5557_v49 }
 0x1c9   :  { %5559 = vmatprep.subr.bf16.mxu1 %v6298_v53 }
 0x1ca   :  { %5975 = vmatpush3.bf16.msra.mxu0 %v5542_v31  ;;  %v3353_v31 = vld [vmem:[%s7751_s3 + $0x448] sm:$0xff] }
 0x1cb   :  { %5976 = vmatprep.subr.bf16.mxu0 %v6298_v53  ;;  %v5590_v32 = vpack.c.bf16 %v3353_v31, %v3352_v28  ;;  %v3385_v28 = vld [vmem:[%s7751_s3 + $0x548] sm:$0xff] }
 0x1cc   :  { %5561 = vmatpush3.bf16.msra.mxu1 %v5560_v52 }
 0x1cd   :  { %5562 = vmatprep.subr.bf16.mxu1 %v6298_v53 }
 0x1ce   :  { %5978 = vmatpush3.bf16.msra.mxu0 %v5545_v34  ;;  %v3355_v34 = vld [vmem:[%s7751_s3 + $0x458] sm:$0xff] }
 0x1cf   :  { %5979 = vmatprep.subr.bf16.mxu0 %v6298_v53  ;;  %v5593_v35 = vpack.c.bf16 %v3355_v34, %v3354_v33  ;;  %v3387_v33 = vld [vmem:[%s7751_s3 + $0x558] sm:$0xff] }
 0x1d0   :  { %5564 = vmatpush3.bf16.msra.mxu1 %v5563_v57 }
 0x1d1   :  { %5565 = vmatprep.subr.bf16.mxu1 %v6298_v53 }
 0x1d2   :  { %5981 = vmatpush3.bf16.msra.mxu0 %v5548_v38  ;;  %v2527_v38 = vrot.slane %v6769_v30, 7 }
 0x1d3   :  { %5982 = vmatprep.subr.bf16.mxu0 %v6298_v53 }
 0x1d4   :  { %5567 = vmatpush3.bf16.msra.mxu1 %v5566_v61 }
 0x1d5   :  { %5568 = vmatprep.subr.bf16.mxu1 %v6298_v53 }
 0x1d6   :  { %5984 = vmatpush3.bf16.msra.mxu0 %v5551_v41  ;;  %v3359_v41 = vld [vmem:[%s7751_s3 + $0x478] sm:$0xff] }
 0x1d7   :  { %5985 = vmatprep.subr.bf16.mxu0 %v6298_v53  ;;  %v5599_v42 = vpack.c.bf16 %v3359_v41, %v3358_v40  ;;  %v3391_v40 = vld [vmem:[%s7751_s3 + $0x578] sm:$0xff] }
 0x1d8   :  { %5570 = vmatpush3.bf16.msra.mxu1 %v5569_v2 }
 0x1d9   :  { %5020 = vmatmul.mubr.f32.vlgmr.msra.gmra.mrb[4].mxu0 %v2454_v8  ;;  %5571 = vmatprep.subr.bf16.mxu1 %v6298_v53  ;;  %v7271_v8 = vmax.f32 %v6767_v24, 0.0  ;;  %v5623_v24 = vpack.c.bf16 %v3375_v13, %v3374_v12  ;;  %v3406_v13 = vld [vmem:[%s7751_s3 + $0x5f0] sm:$0xff] }
 0x1da   :  { %5987 = vmatpush3.bf16.msra.mxu0 %v5554_v44  ;;  %5054 = vmatprep.mubr.msk.f32.mxu0 %vm6299_vm3, %v6300_v29  ;;  %v3361_v44 = vld [vmem:[%s7751_s3 + $0x488] sm:$0xff] }
 0x1db   :  { %5988 = vmatprep.subr.bf16.mxu0 %v6298_v53  ;;  %v5602_v45 = vpack.c.bf16 %v3361_v44, %v3360_v43  ;;  %v2672_v37 = vrot.slane %v7271_v8, 1  ;;  %v3393_v43 = vld [vmem:[%s7751_s3 + $0x588] sm:$0xff] }
 0x1dc   :  { %5573 = vmatpush3.bf16.msra.mxu1 %v5572_v9 }
 0x1dd   :  { %5574 = vmatprep.subr.bf16.mxu1 %v6298_v53 }
 0x1de   :  { %5990 = vmatpush3.bf16.msra.mxu0 %v5557_v49  ;;  %v3363_v49 = vld [vmem:[%s7751_s3 + $0x498] sm:$0xff] }
 0x1df   :  { %5991 = vmatprep.subr.bf16.mxu0 %v6298_v53  ;;  %v5605_v50 = vpack.c.bf16 %v3363_v49, %v3362_v48  ;;  %v3394_v48 = vld [vmem:[%s7751_s3 + $0x590] sm:$0xff]  ;;  %v3395_v49 = vld [vmem:[%s7751_s3 + $0x598] sm:$0xff] }
 0x1e0   :  { %5576 = vmatpush3.bf16.msra.mxu1 %v5575_v11 }
 0x1e1   :  { %5577 = vmatprep.subr.bf16.mxu1 %v6298_v53 }
 0x1e2   :  { %5993 = vmatpush3.bf16.msra.mxu0 %v5560_v52  ;;  %v5608_v52 = vpack.c.bf16 %v3365_v51, %v3364_v62  ;;  %v3396_v62 = vld [vmem:[%s7751_s3 + $0x5a0] sm:$0xff]  ;;  %v3397_v51 = vld [vmem:[%s7751_s3 + $0x5a8] sm:$0xff] }
 0x1e3   :  { %4432 = vmatmul.mubr.f32.vlgmr.msra.gmra.mrb[2].mxu1 %v965_v19  ;;  %5994 = vmatprep.subr.bf16.mxu0 %v6298_v53  ;;  %v3378_v19 = vld [vmem:[%s7751_s3 + $0x510] sm:$0xff] }
 0x1e4   :  { %5579 = vmatpush3.bf16.msra.mxu1 %v5578_v18  ;;  %4466 = vmatprep.mubr.msk.f32.mxu1 %vm6299_vm3, %v6300_v29  ;;  %v5629_v5 = vpack.c.bf16 %v3379_v3, %v3378_v19  ;;  %v1324_v19 = vrot.slane %v7218_v46, 3  ;;  %v3410_v3 = vld [vmem:[%s7751_s3 + $0x610] sm:$0xff] }
 0x1e5   :  { %5580 = vmatprep.subr.bf16.mxu1 %v6298_v53 }
 0x1e6   :  { %5996 = vmatpush3.bf16.msra.mxu0 %v5563_v57  ;;  %v5611_v57 = vpack.c.bf16 %v3367_v56, %v3366_v55  ;;  %v3398_v55 = vld [vmem:[%s7751_s3 + $0x5b0] sm:$0xff]  ;;  %v3399_v56 = vld [vmem:[%s7751_s3 + $0x5b8] sm:$0xff] }
 0x1e7   :  { %5997 = vmatprep.subr.bf16.mxu0 %v6298_v53 }
 0x1e8   :  { %5582 = vmatpush3.bf16.msra.mxu1 %v5581_v14 }
 0x1e9   :  { %5583 = vmatprep.subr.bf16.mxu1 %v6298_v53 }
 0x1ea   :  { %5999 = vmatpush3.bf16.msra.mxu0 %v5566_v61  ;;  %v5614_v61 = vpack.c.bf16 %v3369_v60, %v3368_v58  ;;  %v3400_v58 = vld [vmem:[%s7751_s3 + $0x5c0] sm:$0xff]  ;;  %v3401_v60 = vld [vmem:[%s7751_s3 + $0x5c8] sm:$0xff] }
 0x1eb   :  { %6000 = vmatprep.subr.bf16.mxu0 %v6298_v53 }
 0x1ec   :  { %5585 = vmatpush3.bf16.msra.mxu1 %v5584_v21 }
 0x1ed   :  { %5586 = vmatprep.subr.bf16.mxu1 %v6298_v53 }
 0x1ee   :  { %6002 = vmatpush3.bf16.msra.mxu0 %v5569_v2  ;;  %v5617_v2 = vpack.c.bf16 %v3371_v1, %v3370_v63  ;;  %v3402_v63 = vld [vmem:[%s7751_s3 + $0x5d0] sm:$0xff]  ;;  %v3403_v1 = vld [vmem:[%s7751_s3 + $0x5d8] sm:$0xff] }
 0x1ef   :  { %6003 = vmatprep.subr.bf16.mxu0 %v6298_v53 }
 0x1f0   :  { %5588 = vmatpush3.bf16.msra.mxu1 %v5587_v27 }
 0x1f1   :  { %5589 = vmatprep.subr.bf16.mxu1 %v6298_v53 }
 0x1f2   :  { %6005 = vmatpush3.bf16.msra.mxu0 %v5572_v9  ;;  %v5620_v9 = vpack.c.bf16 %v3373_v7, %v3372_v6  ;;  %v3404_v6 = vld [vmem:[%s7751_s3 + $0x5e0] sm:$0xff]  ;;  %v3405_v7 = vld [vmem:[%s7751_s3 + $0x5e8] sm:$0xff] }
 0x1f3   :  { %6006 = vmatprep.subr.bf16.mxu0 %v6298_v53  ;;  %v5668_v12 = vpack.c.bf16 %v3405_v7, %v3404_v6  ;;  %v3436_v7 = vld [vmem:[%s7751_s3 + $0x6e0] sm:$0xff] }
 0x1f4   :  { %5591 = vmatpush3.bf16.msra.mxu1 %v5590_v32 }
 0x1f5   :  { %5592 = vmatprep.subr.bf16.mxu1 %v6298_v53 }
 0x1f6   :  { %6008 = vmatpush3.bf16.msra.mxu0 %v5575_v11  ;;  %v3376_v11 = vld [vmem:[%s7751_s3 + $0x500] sm:$0xff] }
 0x1f7   :  { %6009 = vmatprep.subr.bf16.mxu0 %v6298_v53  ;;  %v5626_v17 = vpack.c.bf16 %v3377_v16, %v3376_v11  ;;  %v3408_v16 = vld [vmem:[%s7751_s3 + $0x600] sm:$0xff] }
 0x1f8   :  { %5594 = vmatpush3.bf16.msra.mxu1 %v5593_v35 }
 0x1f9   :  { %5055 = vmatmul.mubr.f32.vlgmr.msra.gmra.mrb[4].mxu0 %v2527_v38  ;;  %5595 = vmatprep.subr.bf16.mxu1 %v6298_v53 }
 0x1fa   :  { %6011 = vmatpush3.bf16.msra.mxu0 %v5578_v18  ;;  %5089 = vmatprep.mubr.msk.f32.mxu0 %vm6299_vm3, %v6300_v29  ;;  %v1144_v18 = vrot.slane %v7218_v46, 1 }
 0x1fb   :  { %6012 = vmatprep.subr.bf16.mxu0 %v6298_v53 }
 0x1fc   :  { %5597 = vmatpush3.bf16.msra.mxu1 %v5596_v39 }
 0x1fd   :  { %5598 = vmatprep.subr.bf16.mxu1 %v6298_v53 }
 0x1fe   :  { %6014 = vmatpush3.bf16.msra.mxu0 %v5581_v14  ;;  %v3380_v14 = vld [vmem:[%s7751_s3 + $0x520] sm:$0xff] }
 0x1ff   :  { %6015 = vmatprep.subr.bf16.mxu0 %v6298_v53  ;;  %v5632_v20 = vpack.c.bf16 %v3381_v0, %v3380_v14  ;;  %v3412_v0 = vld [vmem:[%s7751_s3 + $0x620] sm:$0xff] }
 0x200   :  { %5600 = vmatpush3.bf16.msra.mxu1 %v5599_v42 }
 0x201   :  { %5601 = vmatprep.subr.bf16.mxu1 %v6298_v53 }
 0x202   :  { %6017 = vmatpush3.bf16.msra.mxu0 %v5584_v21  ;;  %v3382_v21 = vld [vmem:[%s7751_s3 + $0x530] sm:$0xff] }
 0x203   :  { %4467 = vmatmul.mubr.f32.vlgmr.msra.gmra.mrb[2].mxu1 %v7218_v46  ;;  %6018 = vmatprep.subr.bf16.mxu0 %v6298_v53  ;;  %v5635_v26 = vpack.c.bf16 %v3383_v23, %v3382_v21  ;;  %v3414_v23 = vld [vmem:[%s7751_s3 + $0x630] sm:$0xff] }
 0x204   :  { %5603 = vmatpush3.bf16.msra.mxu1 %v5602_v45  ;;  %4501 = vmatprep.mubr.msk.f32.mxu1 %vm6299_vm3, %v6300_v29 }
 0x205   :  { %5604 = vmatprep.subr.bf16.mxu1 %v6298_v53 }
 0x206   :  { %6020 = vmatpush3.bf16.msra.mxu0 %v5587_v27  ;;  %v3384_v27 = vld [vmem:[%s7751_s3 + $0x540] sm:$0xff] }
 0x207   :  { %6021 = vmatprep.subr.bf16.mxu0 %v6298_v53  ;;  %v5638_v31 = vpack.c.bf16 %v3385_v28, %v3384_v27  ;;  %v3416_v28 = vld [vmem:[%s7751_s3 + $0x640] sm:$0xff] }
 0x208   :  { %5606 = vmatpush3.bf16.msra.mxu1 %v5605_v50 }
 0x209   :  { %5607 = vmatprep.subr.bf16.mxu1 %v6298_v53 }
 0x20a   :  { %6023 = vmatpush3.bf16.msra.mxu0 %v5590_v32  ;;  %v3386_v32 = vld [vmem:[%s7751_s3 + $0x550] sm:$0xff] }
 0x20b   :  { %6024 = vmatprep.subr.bf16.mxu0 %v6298_v53  ;;  %v5641_v34 = vpack.c.bf16 %v3387_v33, %v3386_v32  ;;  %v3418_v33 = vld [vmem:[%s7751_s3 + $0x650] sm:$0xff] }
 0x20c   :  { %5609 = vmatpush3.bf16.msra.mxu1 %v5608_v52 }
 0x20d   :  { %5610 = vmatprep.subr.bf16.mxu1 %v6298_v53 }
 0x20e   :  { %6026 = vmatpush3.bf16.msra.mxu0 %v5593_v35  ;;  %v3388_v35 = vld [vmem:[%s7751_s3 + $0x560] sm:$0xff] }
 0x20f   :  { %6027 = vmatprep.subr.bf16.mxu0 %v6298_v53  ;;  %v5644_v38 = vpack.c.bf16 %v3389_v36, %v3388_v35  ;;  %v3420_v36 = vld [vmem:[%s7751_s3 + $0x660] sm:$0xff] }
 0x210   :  { %5612 = vmatpush3.bf16.msra.mxu1 %v5611_v57 }
 0x211   :  { %5613 = vmatprep.subr.bf16.mxu1 %v6298_v53 }
 0x212   :  { %6029 = vmatpush3.bf16.msra.mxu0 %v5596_v39  ;;  %v3390_v39 = vld [vmem:[%s7751_s3 + $0x570] sm:$0xff] }
 0x213   :  { %6030 = vmatprep.subr.bf16.mxu0 %v6298_v53  ;;  %v5647_v41 = vpack.c.bf16 %v3391_v40, %v3390_v39  ;;  %v3422_v40 = vld [vmem:[%s7751_s3 + $0x670] sm:$0xff] }
 0x214   :  { %5615 = vmatpush3.bf16.msra.mxu1 %v5614_v61 }
 0x215   :  { %5616 = vmatprep.subr.bf16.mxu1 %v6298_v53 }
 0x216   :  { %6032 = vmatpush3.bf16.msra.mxu0 %v5599_v42  ;;  %v3392_v42 = vld [vmem:[%s7751_s3 + $0x580] sm:$0xff] }
 0x217   :  { %6033 = vmatprep.subr.bf16.mxu0 %v6298_v53  ;;  %v5650_v44 = vpack.c.bf16 %v3393_v43, %v3392_v42  ;;  %v3424_v43 = vld [vmem:[%s7751_s3 + $0x680] sm:$0xff] }
 0x218   :  { %5618 = vmatpush3.bf16.msra.mxu1 %v5617_v2 }
 0x219   :  { %5090 = vmatmul.mubr.f32.vlgmr.msra.gmra.mrb[4].mxu0 %v7271_v8  ;;  %5619 = vmatprep.subr.bf16.mxu1 %v6298_v53 }
 0x21a   :  { %6035 = vmatpush3.bf16.msra.mxu0 %v5602_v45  ;;  %5124 = vmatprep.mubr.msk.f32.mxu0 %vm6299_vm3, %v6300_v29  ;;  %v1234_v45 = vrot.slane %v7218_v46, 2 }
 0x21b   :  { %6036 = vmatprep.subr.bf16.mxu0 %v6298_v53 }
 0x21c   :  { %5621 = vmatpush3.bf16.msra.mxu1 %v5620_v9 }
 0x21d   :  { %5622 = vmatprep.subr.bf16.mxu1 %v6298_v53 }
 0x21e   :  { %6038 = vmatpush3.bf16.msra.mxu0 %v5605_v50  ;;  %v5653_v50 = vpack.c.bf16 %v3395_v49, %v3394_v48  ;;  %v1414_v48 = vrot.slane %v7218_v46, 4  ;;  %v3426_v49 = vld [vmem:[%s7751_s3 + $0x690] sm:$0xff] }
 0x21f   :  { %6039 = vmatprep.subr.bf16.mxu0 %v6298_v53 }
 0x220   :  { %5624 = vmatpush3.bf16.msra.mxu1 %v5623_v24 }
 0x221   :  { %5625 = vmatprep.subr.bf16.mxu1 %v6298_v53 }
 0x222   :  { %6041 = vmatpush3.bf16.msra.mxu0 %v5608_v52  ;;  %v5656_v52 = vpack.c.bf16 %v3397_v51, %v3396_v62  ;;  %v3428_v51 = vld [vmem:[%s7751_s3 + $0x6a0] sm:$0xff] }
 0x223   :  { %4502 = vmatmul.mubr.f32.vlgmr.msra.gmra.mrb[2].mxu1 %v1144_v18  ;;  %6042 = vmatprep.subr.bf16.mxu0 %v6298_v53 }
 0x224   :  { %5627 = vmatpush3.bf16.msra.mxu1 %v5626_v17  ;;  %4536 = vmatprep.mubr.msk.f32.mxu1 %vm6299_vm3, %v6300_v29 }
 0x225   :  { %5628 = vmatprep.subr.bf16.mxu1 %v6298_v53 }
 0x226   :  { %6044 = vmatpush3.bf16.msra.mxu0 %v5611_v57  ;;  %v5659_v57 = vpack.c.bf16 %v3399_v56, %v3398_v55  ;;  %v3430_v56 = vld [vmem:[%s7751_s3 + $0x6b0] sm:$0xff] }
 0x227   :  { %6045 = vmatprep.subr.bf16.mxu0 %v6298_v53 }
 0x228   :  { %5630 = vmatpush3.bf16.msra.mxu1 %v5629_v5 }
 0x229   :  { %5631 = vmatprep.subr.bf16.mxu1 %v6298_v53 }
 0x22a   :  { %6047 = vmatpush3.bf16.msra.mxu0 %v5614_v61  ;;  %v5662_v61 = vpack.c.bf16 %v3401_v60, %v3400_v58  ;;  %v3432_v60 = vld [vmem:[%s7751_s3 + $0x6c0] sm:$0xff] }
 0x22b   :  { %6048 = vmatprep.subr.bf16.mxu0 %v6298_v53 }
 0x22c   :  { %5633 = vmatpush3.bf16.msra.mxu1 %v5632_v20 }
 0x22d   :  { %5634 = vmatprep.subr.bf16.mxu1 %v6298_v53 }
 0x22e   :  { %6050 = vmatpush3.bf16.msra.mxu0 %v5617_v2  ;;  %v5665_v2 = vpack.c.bf16 %v3403_v1, %v3402_v63  ;;  %v3434_v1 = vld [vmem:[%s7751_s3 + $0x6d0] sm:$0xff] }
 0x22f   :  { %6051 = vmatprep.subr.bf16.mxu0 %v6298_v53 }
 0x230   :  { %5636 = vmatpush3.bf16.msra.mxu1 %v5635_v26 }
 0x231   :  { %5637 = vmatprep.subr.bf16.mxu1 %v6298_v53 }
 0x232   :  { %6053 = vmatpush3.bf16.msra.mxu0 %v5620_v9  ;;  %v2745_v9 = vrot.slane %v7271_v8, 2 }
 0x233   :  { %6054 = vmatprep.subr.bf16.mxu0 %v6298_v53 }
 0x234   :  { %5639 = vmatpush3.bf16.msra.mxu1 %v5638_v31 }
 0x235   :  { %5640 = vmatprep.subr.bf16.mxu1 %v6298_v53 }
 0x236   :  { %6056 = vmatpush3.bf16.msra.mxu0 %v5623_v24  ;;  %v3407_v24 = vld [vmem:[%s7751_s3 + $0x5f8] sm:$0xff] }
 0x237   :  { %6057 = vmatprep.subr.bf16.mxu0 %v6298_v53  ;;  %v5671_v11 = vpack.c.bf16 %v3407_v24, %v3406_v13  ;;  %v3438_v24 = vld [vmem:[%s7751_s3 + $0x6f0] sm:$0xff] }
 0x238   :  { %5642 = vmatpush3.bf16.msra.mxu1 %v5641_v34 }
 0x239   :  { %5125 = vmatmul.mubr.f32.vlgmr.msra.gmra.mrb[4].mxu0 %v2672_v37  ;;  %5643 = vmatprep.subr.bf16.mxu1 %v6298_v53  ;;  %v3421_v37 = vld [vmem:[%s7751_s3 + $0x668] sm:$0xff] }
 0x23a   :  { %6059 = vmatpush3.bf16.msra.mxu0 %v5626_v17  ;;  %5159 = vmatprep.mubr.msk.f32.mxu0 %vm6299_vm3, %v6300_v29  ;;  %v3409_v17 = vld [vmem:[%s7751_s3 + $0x608] sm:$0xff]  ;;  %v5692_v39 = vpack.c.bf16 %v3421_v37, %v3420_v36  ;;  %v3452_v37 = vld [vmem:[%s7751_s3 + $0x760] sm:$0xff] }
 0x23b   :  { %6060 = vmatprep.subr.bf16.mxu0 %v6298_v53  ;;  %v5674_v18 = vpack.c.bf16 %v3409_v17, %v3408_v16  ;;  %v3440_v17 = vld [vmem:[%s7751_s3 + $0x700] sm:$0xff] }
 0x23c   :  { %5645 = vmatpush3.bf16.msra.mxu1 %v5644_v38 }
 0x23d   :  { %5646 = vmatprep.subr.bf16.mxu1 %v6298_v53 }
 0x23e   :  { %6062 = vmatpush3.bf16.msra.mxu0 %v5629_v5  ;;  %v3411_v5 = vld [vmem:[%s7751_s3 + $0x618] sm:$0xff] }
 0x23f   :  { %6063 = vmatprep.subr.bf16.mxu0 %v6298_v53  ;;  %v5677_v14 = vpack.c.bf16 %v3411_v5, %v3410_v3  ;;  %v1504_v3 = vrot.slane %v7218_v46, 5  ;;  %v3442_v5 = vld [vmem:[%s7751_s3 + $0x710] sm:$0xff] }
 0x240   :  { %5648 = vmatpush3.bf16.msra.mxu1 %v5647_v41 }
 0x241   :  { %5649 = vmatprep.subr.bf16.mxu1 %v6298_v53 }
 0x242   :  { %6065 = vmatpush3.bf16.msra.mxu0 %v5632_v20  ;;  %v3413_v20 = vld [vmem:[%s7751_s3 + $0x628] sm:$0xff] }
 0x243   :  { %4537 = vmatmul.mubr.f32.vlgmr.msra.gmra.mrb[2].mxu1 %v1234_v45  ;;  %6066 = vmatprep.subr.bf16.mxu0 %v6298_v53  ;;  %v5680_v21 = vpack.c.bf16 %v3413_v20, %v3412_v0  ;;  %v3444_v20 = vld [vmem:[%s7751_s3 + $0x720] sm:$0xff] }
 0x244   :  { %5651 = vmatpush3.bf16.msra.mxu1 %v5650_v44  ;;  %4571 = vmatprep.mubr.msk.f32.mxu1 %vm6299_vm3, %v6300_v29 }
 0x245   :  { %5652 = vmatprep.subr.bf16.mxu1 %v6298_v53 }
 0x246   :  { %6068 = vmatpush3.bf16.msra.mxu0 %v5635_v26  ;;  %v3415_v26 = vld [vmem:[%s7751_s3 + $0x638] sm:$0xff] }
 0x247   :  { %6069 = vmatprep.subr.bf16.mxu0 %v6298_v53  ;;  %v5683_v27 = vpack.c.bf16 %v3415_v26, %v3414_v23  ;;  %v3446_v26 = vld [vmem:[%s7751_s3 + $0x730] sm:$0xff] }
 0x248   :  { %5654 = vmatpush3.bf16.msra.mxu1 %v5653_v50 }
 0x249   :  { %5655 = vmatprep.subr.bf16.mxu1 %v6298_v53 }
 0x24a   :  { %6071 = vmatpush3.bf16.msra.mxu0 %v5638_v31  ;;  %v3417_v31 = vld [vmem:[%s7751_s3 + $0x648] sm:$0xff] }
 0x24b   :  { %6072 = vmatprep.subr.bf16.mxu0 %v6298_v53  ;;  %v5686_v32 = vpack.c.bf16 %v3417_v31, %v3416_v28  ;;  %v3448_v31 = vld [vmem:[%s7751_s3 + $0x740] sm:$0xff] }
 0x24c   :  { %5657 = vmatpush3.bf16.msra.mxu1 %v5656_v52 }
 0x24d   :  { %5658 = vmatprep.subr.bf16.mxu1 %v6298_v53 }
 0x24e   :  { %6074 = vmatpush3.bf16.msra.mxu0 %v5641_v34  ;;  %v3419_v34 = vld [vmem:[%s7751_s3 + $0x658] sm:$0xff] }
 0x24f   :  { %6075 = vmatprep.subr.bf16.mxu0 %v6298_v53  ;;  %v5689_v35 = vpack.c.bf16 %v3419_v34, %v3418_v33  ;;  %v3450_v34 = vld [vmem:[%s7751_s3 + $0x750] sm:$0xff] }
 0x250   :  { %5660 = vmatpush3.bf16.msra.mxu1 %v5659_v57 }
 0x251   :  { %5661 = vmatprep.subr.bf16.mxu1 %v6298_v53 }
 0x252   :  { %6077 = vmatpush3.bf16.msra.mxu0 %v5644_v38  ;;  %v2818_v38 = vrot.slane %v7271_v8, 3 }
 0x253   :  { %6078 = vmatprep.subr.bf16.mxu0 %v6298_v53 }
 0x254   :  { %5663 = vmatpush3.bf16.msra.mxu1 %v5662_v61 }
 0x255   :  { %5664 = vmatprep.subr.bf16.mxu1 %v6298_v53 }
 0x256   :  { %6080 = vmatpush3.bf16.msra.mxu0 %v5647_v41  ;;  %v3423_v41 = vld [vmem:[%s7751_s3 + $0x678] sm:$0xff] }
 0x257   :  { %6081 = vmatprep.subr.bf16.mxu0 %v6298_v53  ;;  %v5695_v42 = vpack.c.bf16 %v3423_v41, %v3422_v40  ;;  %v3454_v41 = vld [vmem:[%s7751_s3 + $0x770] sm:$0xff] }
 0x258   :  { %5666 = vmatpush3.bf16.msra.mxu1 %v5665_v2 }
 0x259   :  { %5160 = vmatmul.mubr.f32.vlgmr.msra.gmra.mrb[4].mxu0 %v2745_v9  ;;  %5667 = vmatprep.subr.bf16.mxu1 %v6298_v53  ;;  %v3437_v9 = vld [vmem:[%s7751_s3 + $0x6e8] sm:$0xff] }
 0x25a   :  { %6083 = vmatpush3.bf16.msra.mxu0 %v5650_v44  ;;  %5194 = vmatprep.mubr.msk.f32.mxu0 %vm6299_vm3, %v6300_v29  ;;  %v3425_v44 = vld [vmem:[%s7751_s3 + $0x688] sm:$0xff]  ;;  %v5716_v13 = vpack.c.bf16 %v3437_v9, %v3436_v7  ;;  %v3468_v9 = vld [vmem:[%s7751_s3 + $0x7e0] sm:$0xff] }
 0x25b   :  { %6084 = vmatprep.subr.bf16.mxu0 %v6298_v53  ;;  %v5698_v45 = vpack.c.bf16 %v3425_v44, %v3424_v43  ;;  %v3456_v44 = vld [vmem:[%s7751_s3 + $0x780] sm:$0xff] }
 0x25c   :  { %5669 = vmatpush3.bf16.msra.mxu1 %v5668_v12 }
 0x25d   :  { %5670 = vmatprep.subr.bf16.mxu1 %v6298_v53 }
 0x25e   :  { %6086 = vmatpush3.bf16.msra.mxu0 %v5653_v50  ;;  %v3427_v50 = vld [vmem:[%s7751_s3 + $0x698] sm:$0xff] }
 0x25f   :  { %6087 = vmatprep.subr.bf16.mxu0 %v6298_v53  ;;  %v5701_v62 = vpack.c.bf16 %v3427_v50, %v3426_v49  ;;  %v1594_v49 = vrot.slane %v7218_v46, 6  ;;  %v3458_v50 = vld [vmem:[%s7751_s3 + $0x790] sm:$0xff] }
 0x260   :  { %5672 = vmatpush3.bf16.msra.mxu1 %v5671_v11 }
 0x261   :  { %5673 = vmatprep.subr.bf16.mxu1 %v6298_v53 }
 0x262   :  { %6089 = vmatpush3.bf16.msra.mxu0 %v5656_v52  ;;  %v3429_v52 = vld [vmem:[%s7751_s3 + $0x6a8] sm:$0xff] }
 0x263   :  { %4572 = vmatmul.mubr.f32.vlgmr.msra.gmra.mrb[2].mxu1 %v1324_v19  ;;  %6090 = vmatprep.subr.bf16.mxu0 %v6298_v53  ;;  %v5704_v55 = vpack.c.bf16 %v3429_v52, %v3428_v51  ;;  %v3460_v52 = vld [vmem:[%s7751_s3 + $0x7a0] sm:$0xff] }
 0x264   :  { %5675 = vmatpush3.bf16.msra.mxu1 %v5674_v18  ;;  %4606 = vmatprep.mubr.msk.f32.mxu1 %vm6299_vm3, %v6300_v29 }
 0x265   :  { %5676 = vmatprep.subr.bf16.mxu1 %v6298_v53 }
 0x266   :  { %6092 = vmatpush3.bf16.msra.mxu0 %v5659_v57  ;;  %v3431_v57 = vld [vmem:[%s7751_s3 + $0x6b8] sm:$0xff] }
 0x267   :  { %6093 = vmatprep.subr.bf16.mxu0 %v6298_v53  ;;  %v5707_v58 = vpack.c.bf16 %v3431_v57, %v3430_v56  ;;  %v3462_v57 = vld [vmem:[%s7751_s3 + $0x7b0] sm:$0xff] }
 0x268   :  { %5678 = vmatpush3.bf16.msra.mxu1 %v5677_v14 }
 0x269   :  { %5679 = vmatprep.subr.bf16.mxu1 %v6298_v53 }
 0x26a   :  { %6095 = vmatpush3.bf16.msra.mxu0 %v5662_v61  ;;  %v3433_v61 = vld [vmem:[%s7751_s3 + $0x6c8] sm:$0xff] }
 0x26b   :  { %6096 = vmatprep.subr.bf16.mxu0 %v6298_v53  ;;  %v5710_v63 = vpack.c.bf16 %v3433_v61, %v3432_v60  ;;  %v3464_v61 = vld [vmem:[%s7751_s3 + $0x7c0] sm:$0xff] }
 0x26c   :  { %5681 = vmatpush3.bf16.msra.mxu1 %v5680_v21 }
 0x26d   :  { %5682 = vmatprep.subr.bf16.mxu1 %v6298_v53 }
 0x26e   :  { %6098 = vmatpush3.bf16.msra.mxu0 %v5665_v2  ;;  %v3435_v2 = vld [vmem:[%s7751_s3 + $0x6d8] sm:$0xff] }
 0x26f   :  { %6099 = vmatprep.subr.bf16.mxu0 %v6298_v53  ;;  %v5713_v6 = vpack.c.bf16 %v3435_v2, %v3434_v1  ;;  %v3466_v2 = vld [vmem:[%s7751_s3 + $0x7d0] sm:$0xff] }
 0x270   :  { %5684 = vmatpush3.bf16.msra.mxu1 %v5683_v27 }
 0x271   :  { %5685 = vmatprep.subr.bf16.mxu1 %v6298_v53 }
 0x272   :  { %6101 = vmatpush3.bf16.msra.mxu0 %v5668_v12  ;;  %v2891_v12 = vrot.slane %v7271_v8, 4 }
 0x273   :  { %6102 = vmatprep.subr.bf16.mxu0 %v6298_v53 }
 0x274   :  { %5687 = vmatpush3.bf16.msra.mxu1 %v5686_v32 }
 0x275   :  { %5688 = vmatprep.subr.bf16.mxu1 %v6298_v53 }
 0x276   :  { %6104 = vmatpush3.bf16.msra.mxu0 %v5671_v11  ;;  %v3439_v11 = vld [vmem:[%s7751_s3 + $0x6f8] sm:$0xff] }
 0x277   :  { %6105 = vmatprep.subr.bf16.mxu0 %v6298_v53  ;;  %v5719_v16 = vpack.c.bf16 %v3439_v11, %v3438_v24  ;;  %v3470_v11 = vld [vmem:[%s7751_s3 + $0x7f0] sm:$0xff] }
 0x278   :  { %5690 = vmatpush3.bf16.msra.mxu1 %v5689_v35 }
 0x279   :  { %5195 = vmatmul.mubr.f32.vlgmr.msra.gmra.mrb[4].mxu0 %v2818_v38  ;;  %5691 = vmatprep.subr.bf16.mxu1 %v6298_v53  ;;  %v3453_v38 = vld [vmem:[%s7751_s3 + $0x768] sm:$0xff] }
 0x27a   :  { %6107 = vmatpush3.bf16.msra.mxu0 %v5674_v18  ;;  %5229 = vmatprep.mubr.msk.f32.mxu0 %vm6299_vm3, %v6300_v29  ;;  %v3441_v18 = vld [vmem:[%s7751_s3 + $0x708] sm:$0xff]  ;;  %v5740_v40 = vpack.c.bf16 %v3453_v38, %v3452_v37 }
 0x27b   :  { %6108 = vmatprep.subr.bf16.mxu0 %v6298_v53  ;;  %v5722_v19 = vpack.c.bf16 %v3441_v18, %v3440_v17  ;;  %v1684_v18 = vrot.slane %v7218_v46, 7 }
 0x27c   :  { %5693 = vmatpush3.bf16.msra.mxu1 %v5692_v39 }
 0x27d   :  { %5694 = vmatprep.subr.bf16.mxu1 %v6298_v53 }
 0x27e   :  { %6110 = vmatpush3.bf16.msra.mxu0 %v5677_v14  ;;  %v3443_v14 = vld [vmem:[%s7751_s3 + $0x718] sm:$0xff] }
 0x27f   :  { %6111 = vmatprep.subr.bf16.mxu0 %v6298_v53  ;;  %v5725_v0 = vpack.c.bf16 %v3443_v14, %v3442_v5 }
 0x280   :  { %5696 = vmatpush3.bf16.msra.mxu1 %v5695_v42 }
 0x281   :  { %5697 = vmatprep.subr.bf16.mxu1 %v6298_v53 }
 0x282   :  { %6113 = vmatpush3.bf16.msra.mxu0 %v5680_v21  ;;  %v3445_v21 = vld [vmem:[%s7751_s3 + $0x728] sm:$0xff] }
 0x283   :  { %4607 = vmatmul.mubr.f32.vlgmr.msra.gmra.mrb[2].mxu1 %v1414_v48  ;;  %6114 = vmatprep.subr.bf16.mxu0 %v6298_v53  ;;  %v5728_v23 = vpack.c.bf16 %v3445_v21, %v3444_v20 }
 0x284   :  { %5699 = vmatpush3.bf16.msra.mxu1 %v5698_v45  ;;  %4641 = vmatprep.mubr.msk.f32.mxu1 %vm6299_vm3, %v6300_v29 }
 0x285   :  { %5700 = vmatprep.subr.bf16.mxu1 %v6298_v53 }
 0x286   :  { %6116 = vmatpush3.bf16.msra.mxu0 %v5683_v27  ;;  %v3447_v27 = vld [vmem:[%s7751_s3 + $0x738] sm:$0xff] }
 0x287   :  { %6117 = vmatprep.subr.bf16.mxu0 %v6298_v53  ;;  %v5731_v28 = vpack.c.bf16 %v3447_v27, %v3446_v26 }
 0x288   :  { %5702 = vmatpush3.bf16.msra.mxu1 %v5701_v62 }
 0x289   :  { %5703 = vmatprep.subr.bf16.mxu1 %v6298_v53 }
 0x28a   :  { %6119 = vmatpush3.bf16.msra.mxu0 %v5686_v32  ;;  %v3449_v32 = vld [vmem:[%s7751_s3 + $0x748] sm:$0xff] }
 0x28b   :  { %6120 = vmatprep.subr.bf16.mxu0 %v6298_v53  ;;  %v5734_v33 = vpack.c.bf16 %v3449_v32, %v3448_v31 }
 0x28c   :  { %5705 = vmatpush3.bf16.msra.mxu1 %v5704_v55 }
 0x28d   :  { %5706 = vmatprep.subr.bf16.mxu1 %v6298_v53 }
 0x28e   :  { %6122 = vmatpush3.bf16.msra.mxu0 %v5689_v35  ;;  %v3451_v35 = vld [vmem:[%s7751_s3 + $0x758] sm:$0xff] }
 0x28f   :  { %6123 = vmatprep.subr.bf16.mxu0 %v6298_v53  ;;  %v5737_v36 = vpack.c.bf16 %v3451_v35, %v3450_v34 }
 0x290   :  { %5708 = vmatpush3.bf16.msra.mxu1 %v5707_v58 }
 0x291   :  { %5709 = vmatprep.subr.bf16.mxu1 %v6298_v53 }
 0x292   :  { %6125 = vmatpush3.bf16.msra.mxu0 %v5692_v39  ;;  %v2964_v39 = vrot.slane %v7271_v8, 5 }
 0x293   :  { %6126 = vmatprep.subr.bf16.mxu0 %v6298_v53 }
 0x294   :  { %5711 = vmatpush3.bf16.msra.mxu1 %v5710_v63 }
 0x295   :  { %5712 = vmatprep.subr.bf16.mxu1 %v6298_v53 }
 0x296   :  { %6128 = vmatpush3.bf16.msra.mxu0 %v5695_v42  ;;  %v3455_v42 = vld [vmem:[%s7751_s3 + $0x778] sm:$0xff] }
 0x297   :  { %6129 = vmatprep.subr.bf16.mxu0 %v6298_v53  ;;  %v5743_v43 = vpack.c.bf16 %v3455_v42, %v3454_v41 }
 0x298   :  { %5714 = vmatpush3.bf16.msra.mxu1 %v5713_v6 }
 0x299   :  { %5230 = vmatmul.mubr.f32.vlgmr.msra.gmra.mrb[4].mxu0 %v2891_v12  ;;  %5715 = vmatprep.subr.bf16.mxu1 %v6298_v53  ;;  %v3469_v12 = vld [vmem:[%s7751_s3 + $0x7e8] sm:$0xff] }
 0x29a   :  { %6131 = vmatpush3.bf16.msra.mxu0 %v5698_v45  ;;  %5264 = vmatprep.mubr.msk.f32.mxu0 %vm6299_vm3, %v6300_v29  ;;  %v3457_v45 = vld [vmem:[%s7751_s3 + $0x788] sm:$0xff]  ;;  %v5764_v24 = vpack.c.bf16 %v3469_v12, %v3468_v9 }
 0x29b   :  { %6132 = vmatprep.subr.bf16.mxu0 %v6298_v53  ;;  %v5746_v48 = vpack.c.bf16 %v3457_v45, %v3456_v44 }
 0x29c   :  { %5717 = vmatpush3.bf16.msra.mxu1 %v5716_v13 }
 0x29d   :  { %5718 = vmatprep.subr.bf16.mxu1 %v6298_v53 }
 0x29e   :  { %6134 = vmatpush3.bf16.msra.mxu0 %v5701_v62  ;;  %v3459_v62 = vld [vmem:[%s7751_s3 + $0x798] sm:$0xff] }
 0x29f   :  { %6135 = vmatprep.subr.bf16.mxu0 %v6298_v53  ;;  %v5749_v51 = vpack.c.bf16 %v3459_v62, %v3458_v50 }
 0x2a0   :  { %5720 = vmatpush3.bf16.msra.mxu1 %v5719_v16 }
 0x2a1   :  { %5721 = vmatprep.subr.bf16.mxu1 %v6298_v53 }
 0x2a2   :  { %6137 = vmatpush3.bf16.msra.mxu0 %v5704_v55  ;;  %v3461_v55 = vld [vmem:[%s7751_s3 + $0x7a8] sm:$0xff] }
 0x2a3   :  { %4642 = vmatmul.mubr.f32.vlgmr.msra.gmra.mrb[2].mxu1 %v1504_v3  ;;  %6138 = vmatprep.subr.bf16.mxu0 %v6298_v53  ;;  %v5752_v56 = vpack.c.bf16 %v3461_v55, %v3460_v52 }
 0x2a4   :  { %5723 = vmatpush3.bf16.msra.mxu1 %v5722_v19  ;;  %4676 = vmatprep.mubr.msk.f32.mxu1 %vm6299_vm3, %v6300_v29 }
 0x2a5   :  { %5724 = vmatprep.subr.bf16.mxu1 %v6298_v53 }
 0x2a6   :  { %6140 = vmatpush3.bf16.msra.mxu0 %v5707_v58  ;;  %v3463_v58 = vld [vmem:[%s7751_s3 + $0x7b8] sm:$0xff] }
 0x2a7   :  { %6141 = vmatprep.subr.bf16.mxu0 %v6298_v53  ;;  %v5755_v60 = vpack.c.bf16 %v3463_v58, %v3462_v57 }
 0x2a8   :  { %5726 = vmatpush3.bf16.msra.mxu1 %v5725_v0 }
 0x2a9   :  { %5727 = vmatprep.subr.bf16.mxu1 %v6298_v53 }
 0x2aa   :  { %6143 = vmatpush3.bf16.msra.mxu0 %v5710_v63  ;;  %v3465_v63 = vld [vmem:[%s7751_s3 + $0x7c8] sm:$0xff] }
 0x2ab   :  { %6144 = vmatprep.subr.bf16.mxu0 %v6298_v53  ;;  %v5758_v1 = vpack.c.bf16 %v3465_v63, %v3464_v61 }
 0x2ac   :  { %5729 = vmatpush3.bf16.msra.mxu1 %v5728_v23 }
 0x2ad   :  { %5730 = vmatprep.subr.bf16.mxu1 %v6298_v53 }
 0x2ae   :  { %6146 = vmatpush3.bf16.msra.mxu0 %v5713_v6  ;;  %v3467_v6 = vld [vmem:[%s7751_s3 + $0x7d8] sm:$0xff] }
 0x2af   :  { %6147 = vmatprep.subr.bf16.mxu0 %v6298_v53  ;;  %v5761_v7 = vpack.c.bf16 %v3467_v6, %v3466_v2 }
 0x2b0   :  { %5732 = vmatpush3.bf16.msra.mxu1 %v5731_v28 }
 0x2b1   :  { %5733 = vmatprep.subr.bf16.mxu1 %v6298_v53 }
 0x2b2   :  { %6149 = vmatpush3.bf16.msra.mxu0 %v5716_v13  ;;  %v3037_v13 = vrot.slane %v7271_v8, 6 }
 0x2b3   :  { %6150 = vmatprep.subr.bf16.mxu0 %v6298_v53 }
 0x2b4   :  { %5735 = vmatpush3.bf16.msra.mxu1 %v5734_v33 }
 0x2b5   :  { %5736 = vmatprep.subr.bf16.mxu1 %v6298_v53 }
 0x2b6   :  { %6152 = vmatpush3.bf16.msra.mxu0 %v5719_v16  ;;  %v3471_v16 = vld [vmem:[%s7751_s3 + $0x7f8] sm:$0xff] }
 0x2b7   :  { %6153 = vmatprep.subr.bf16.mxu0 %v6298_v53  ;;  %v5767_v17 = vpack.c.bf16 %v3471_v16, %v3470_v11 }
 0x2b8   :  { %5738 = vmatpush3.bf16.msra.mxu1 %v5737_v36 }
 0x2b9   :  { %5265 = vmatmul.mubr.f32.vlgmr.msra.gmra.mrb[4].mxu0 %v2964_v39  ;;  %5739 = vmatprep.subr.bf16.mxu1 %v6298_v53 }
 0x2ba   :  { %6155 = vmatpush3.bf16.msra.mxu0 %v5722_v19  ;;  %5299 = vmatprep.mubr.msk.f32.mxu0 %vm6299_vm3, %v6300_v29 }
 0x2bb   :  { %6156 = vmatprep.subr.bf16.mxu0 %v6298_v53 }
 0x2bc   :  { %5741 = vmatpush3.bf16.msra.mxu1 %v5740_v40 }
 0x2bd   :  { %5742 = vmatprep.subr.bf16.mxu1 %v6298_v53 }
 0x2be   :  { %6158 = vmatpush3.bf16.msra.mxu0 %v5725_v0 }
 0x2bf   :  { %6159 = vmatprep.subr.bf16.mxu0 %v6298_v53 }
 0x2c0   :  { %5744 = vmatpush3.bf16.msra.mxu1 %v5743_v43 }
 0x2c1   :  { %5745 = vmatprep.subr.bf16.mxu1 %v6298_v53 }
 0x2c2   :  { %6161 = vmatpush3.bf16.msra.mxu0 %v5728_v23 }
 0x2c3   :  { %4677 = vmatmul.mubr.f32.vlgmr.msra.gmra.mrb[2].mxu1 %v1594_v49  ;;  %6162 = vmatprep.subr.bf16.mxu0 %v6298_v53 }
 0x2c4   :  { %5747 = vmatpush3.bf16.msra.mxu1 %v5746_v48  ;;  %4711 = vmatprep.mubr.msk.f32.mxu1 %vm6299_vm3, %v6300_v29 }
 0x2c5   :  { %5748 = vmatprep.subr.bf16.mxu1 %v6298_v53 }
 0x2c6   :  { %6164 = vmatpush3.bf16.msra.mxu0 %v5731_v28 }
 0x2c7   :  { %6165 = vmatprep.subr.bf16.mxu0 %v6298_v53 }
 0x2c8   :  { %5750 = vmatpush3.bf16.msra.mxu1 %v5749_v51 }
 0x2c9   :  { %5751 = vmatprep.subr.bf16.mxu1 %v6298_v53 }
 0x2ca   :  { %6167 = vmatpush3.bf16.msra.mxu0 %v5734_v33 }
 0x2cb   :  { %6168 = vmatprep.subr.bf16.mxu0 %v6298_v53 }
 0x2cc   :  { %5753 = vmatpush3.bf16.msra.mxu1 %v5752_v56 }
 0x2cd   :  { %5754 = vmatprep.subr.bf16.mxu1 %v6298_v53 }
 0x2ce   :  { %6170 = vmatpush3.bf16.msra.mxu0 %v5737_v36 }
 0x2cf   :  { %6171 = vmatprep.subr.bf16.mxu0 %v6298_v53 }
 0x2d0   :  { %5756 = vmatpush3.bf16.msra.mxu1 %v5755_v60 }
 0x2d1   :  { %5757 = vmatprep.subr.bf16.mxu1 %v6298_v53 }
 0x2d2   :  { %6173 = vmatpush3.bf16.msra.mxu0 %v5740_v40 }
 0x2d3   :  { %6174 = vmatprep.subr.bf16.mxu0 %v6298_v53 }
 0x2d4   :  { %5759 = vmatpush3.bf16.msra.mxu1 %v5758_v1 }
 0x2d5   :  { %5760 = vmatprep.subr.bf16.mxu1 %v6298_v53 }
 0x2d6   :  { %6176 = vmatpush3.bf16.msra.mxu0 %v5743_v43 }
 0x2d7   :  { %6177 = vmatprep.subr.bf16.mxu0 %v6298_v53 }
 0x2d8   :  { %5762 = vmatpush3.bf16.msra.mxu1 %v5761_v7 }
 0x2d9   :  { %5300 = vmatmul.mubr.f32.vlgmr.msra.gmra.mrb[4].mxu0 %v3037_v13  ;;  %5763 = vmatprep.subr.bf16.mxu1 %v6298_v53 }
 0x2da   :  { %6179 = vmatpush3.bf16.msra.mxu0 %v5746_v48  ;;  %5334 = vmatprep.mubr.msk.f32.mxu0 %vm6299_vm3, %v6300_v29 }
 0x2db   :  { %6180 = vmatprep.subr.bf16.mxu0 %v6298_v53 }
 0x2dc   :  { %5765 = vmatpush3.bf16.msra.mxu1 %v5764_v24 }
 0x2dd   :  { %5766 = vmatprep.subr.bf16.mxu1 %v6298_v53 }
 0x2de   :  { %6182 = vmatpush3.bf16.msra.mxu0 %v5749_v51 }
 0x2df   :  { %6183 = vmatprep.subr.bf16.mxu0 %v6298_v53 }
 0x2e0   :  { %5768 = vmatpush3.bf16.msra.mxu1 %v5767_v17 }
 0x2e1   :  { %5817 = vmatprep.subr.bf16.mxu1 %v6298_v53 }
 0x2e2   :  { %6185 = vmatpush3.bf16.msra.mxu0 %v5752_v56 }
 0x2e3   :  { %4712 = vmatmul.mubr.f32.vlgmr.msra.gmra.mrb[2].mxu1 %v1684_v18  ;;  %6186 = vmatprep.subr.bf16.mxu0 %v6298_v53 }
 0x2e4   :  { %5819 = vmatpush3.bf16.msra.mxu1 %v6479_v47  ;;  %4809 = vmatprep.mubr.msk.f32.mxu1 %vm6299_vm3, %v6300_v29  ;;  %v3110_v47 = vrot.slane %v7271_v8, 7  ;;  %v3184_v29 = vlaneseq }
 0x2e5   :  { %5820 = vmatprep.subr.bf16.mxu1 %v6298_v53 }
 0x2e6   :  { %6188 = vmatpush3.bf16.msra.mxu0 %v5755_v60  ;;  %v3185_v46 = vshrl.u32 %v3184_v29, 7 }
 0x2e7   :  { %6189 = vmatprep.subr.bf16.mxu0 %v6298_v53 }
 0x2e8   :  { %5822 = vmatpush3.bf16.msra.mxu1 %v6502_v54  ;;  %v3186_v3 = vsub.s32 0, %v3185_v46 }
 0x2e9   :  { %5823 = vmatprep.subr.bf16.mxu1 %v6298_v53 }
 0x2ea   :  { %6191 = vmatpush3.bf16.msra.mxu0 %v5758_v1 }
 0x2eb   :  { %6192 = vmatprep.subr.bf16.mxu0 %v6298_v53 }
 0x2ec   :  { %5825 = vmatpush3.bf16.msra.mxu1 %v6521_v59 }
 0x2ed   :  { %5826 = vmatprep.subr.bf16.mxu1 %v6298_v53 }
 0x2ee   :  { %6194 = vmatpush3.bf16.msra.mxu0 %v5761_v7 }
 0x2ef   :  { %6195 = vmatprep.subr.bf16.mxu0 %v6298_v53 }
 0x2f0   :  { %5828 = vmatpush3.bf16.msra.mxu1 %v6546_v4 }
 0x2f1   :  { %5829 = vmatprep.subr.bf16.mxu1 %v6298_v53 }
 0x2f2   :  { %6197 = vmatpush3.bf16.msra.mxu0 %v5764_v24 }
 0x2f3   :  { %6198 = vmatprep.subr.bf16.mxu0 %v6298_v53 }
 0x2f4   :  { %5831 = vmatpush3.bf16.msra.mxu1 %v6562_v10 }
 0x2f5   :  { %5832 = vmatprep.subr.bf16.mxu1 %v6298_v53 }
 0x2f6   :  { %6200 = vmatpush3.bf16.msra.mxu0 %v5767_v17 }
 0x2f8   :  { %5834 = vmatpush3.bf16.msra.mxu1 %v6578_v15  ;;  %v22_v15 = vld [vmem:[%s7752_s4] sm:$0x1] }
 0x2f9   :  { %5335 = vmatmul.mubr.f32.vlgmr.msra.gmra.mrb[4].mxu0 %v3110_v47  ;;  %5835 = vmatprep.subr.bf16.mxu1 %v6298_v53 }
 0x2fc   :  { %5837 = vmatpush3.bf16.msra.mxu1 %v6632_v22 }
 0x2fd   :  { %5838 = vmatprep.subr.bf16.mxu1 %v6298_v53 }
 0x300   :  { %5840 = vmatpush3.bf16.msra.mxu1 %v6642_v25 }
 0x303   :  { %4810 = vmatmul.mubr.f32.vlgmr.msra.gmra.mrb[4].mxu1 %v6769_v30 }
 0x3b6   :  { %v1752_v54 = vpop.f32.mrb[2].mxu1 }
 0x3b7   :  { %v4713_v59 = vpop.f32.mrb[3].mxu1  ;;  %v6203_v53 = vadd.f32 %v1752_v54, %v22_v15 }
 0x3cc   :  { %v3178_v4 = vpop.f32.mrb[4].mxu0 }
 0x3cd   :  { %v5336_v10 = vpop.f32.mrb[5].mxu0 }
 0x3d6   :  { %v2083_v8 = vpop.f32.mrb[4].mxu1 }
 0x3d7   :  { %v2087_v19 = vadd.f32 %v2083_v8, %v22_v15  ;;  %v4811_v22 = vpop.f32.mrb[5].mxu1 }
 0x3d9   :  { %v6205_v5 = vadd.f32 %v3178_v4, %v2087_v19 }
 0x3db   :  { %v3187_v25 = vrot.slane %v6205_v5, %v3186_v3 }
 0x3dd   :  { %v3190_v30 = vsel %vm3189_vm4, %v6203_v53, %v3187_v25 }
 0x3de   :  { %3192 = vst.msk [vmem:[#allocation2] sm:$0x3] %vm3191_vm5, %v3190_v30 }
 0x3df   :  { %6285 = shalt.err (!%p6282_p4)
}
 0x3e0   :  { %s6286_s1 = scalar_lea.hbm %s7753_s5, 32 }
 0x3e1   :  { %p6287_p5 = scmp.ne.s32.totalorder %s7753_s5, %s6286_s1  ;;  %p6290_p6 = scmp.lt.u32.totalorder %s6286_s1, %s7753_s5 }
 0x3e3   :  { %p6292_p7 = pnand %p6290_p6, %p6287_p5 }
 0x3e5   :  { %6295 = shalt.err (!%p6292_p7)
}
 0x3e6   :  { %3202 = dma.vmem_to_hbm [thread:$0]  %s3200_s22, 32, %s7753_s5, [#allocation3]  }
 0x3e7   :  { %6296 = dma.done.wait [#allocation3], 32  }
 0x3e8   :  { %6297 = vsyncadd [#allocation3], 4294967264 }
 0x3e9   :  { %3206 = vsyncpa [#allocation3], 1 }

</bundles_post_ra>
